<compile_context>
chip_gen: v6e
topology: v6e:2x2x1
jax: 0.10.0
libtpu: 0.0.40
codegen_flags: <defaults>
</compile_context>

<pallas_src>
import jax
import jax.numpy as jnp
from jax.experimental import pallas as pl
from jax.experimental.pallas import tpu as pltpu

# ---------------- model config (small, consistent with the module) -----------
EMBED_DIM = 32                 # embed_dim
HALF = EMBED_DIM // 2          # embed_dim // 2
IM_SIZE = 16                   # im_size (small; original default 32)
INITIAL_STEP = 10              # initial_step
NUM_CHANNELS = 1               # num_channels
LLM_DIM = 384                  # 'all-MiniLM' style llm -> 384
T_C = INITIAL_STEP * NUM_CHANNELS            # per-point x channels
IN_DIM = (T_C + 2) * IM_SIZE * IM_SIZE       # x_proj first Linear in-features

PARAM_ORDER = [
    "xw1x", "xw1g", "xb1", "xw2", "xb2", "xw3", "xb3",        # x_proj
    "sw1", "sb1", "sw2", "sb2", "sw3", "sb3",                  # sentence_proj
    "pw1x", "pw1s", "pb1", "pw2", "pb2", "pw3", "pb3",         # proj_up
]


# ---------------- the single fused Pallas kernel ------------------------------
def _clip_fused_kernel(
    xf_ref, gf_ref, sent_ref,
    xw1x_ref, xw1g_ref, xb1_ref, xw2_ref, xb2_ref, xw3_ref, xb3_ref,
    sw1_ref, sb1_ref, sw2_ref, sb2_ref, sw3_ref, sb3_ref,
    pw1x_ref, pw1s_ref, pb1_ref, pw2_ref, pb2_ref, pw3_ref, pb3_ref,
    out_ref, xemb_ref, semb_ref,
):
    f32 = jnp.float32

    def silu(t):
        return t * jax.nn.sigmoid(t)

    # ---- x branch:  Linear(IN_DIM,32) -> SiLU -> Linear(32,32) -> SiLU -> Linear(32,16)
    # concat(x, grid) folded into split-weight matmul.
    h = (jnp.dot(xf_ref[...], xw1x_ref[...], preferred_element_type=f32)
         + jnp.dot(gf_ref[...], xw1g_ref[...], preferred_element_type=f32)
         + xb1_ref[...])
    h = silu(h)
    h = silu(jnp.dot(h, xw2_ref[...], preferred_element_type=f32) + xb2_ref[...])
    x_emb = jnp.dot(h, xw3_ref[...], preferred_element_type=f32) + xb3_ref[...]

    # ---- sentence branch: Linear(384,32) -> ReLU -> Linear(32,32) -> ReLU -> Linear(32,16)
    s = jnp.maximum(
        jnp.dot(sent_ref[...], sw1_ref[...], preferred_element_type=f32) + sb1_ref[...], 0.0)
    s = jnp.maximum(
        jnp.dot(s, sw2_ref[...], preferred_element_type=f32) + sb2_ref[...], 0.0)
    s_emb = jnp.dot(s, sw3_ref[...], preferred_element_type=f32) + sb3_ref[...]

    # ---- proj_up on stacked embedding: Linear(32,128) -> SiLU -> Linear(128,256)
    #      -> SiLU -> Linear(256, im*im).  concat(x_emb, s_emb) folded into split matmul.
    z = (jnp.dot(x_emb, pw1x_ref[...], preferred_element_type=f32)
         + jnp.dot(s_emb, pw1s_ref[...], preferred_element_type=f32)
         + pb1_ref[...])
    z = silu(z)
    z = silu(jnp.dot(z, pw2_ref[...], preferred_element_type=f32) + pb2_ref[...])
    z = jnp.dot(z, pw3_ref[...], preferred_element_type=f32) + pb3_ref[...]

    out_ref[...] = z.astype(out_ref.dtype)
    xemb_ref[...] = x_emb.astype(xemb_ref.dtype)
    semb_ref[...] = s_emb.astype(semb_ref.dtype)


def _fused_call(args, out_shapes):
    # All operands are small 2-D arrays; give every one a full-extent VMEM block.
    in_specs = [pl.BlockSpec(a.shape, lambda i: (0, 0)) for a in args]
    out_specs = tuple(pl.BlockSpec(s.shape, lambda i: (0, 0)) for s in out_shapes)
    return pl.pallas_call(
        _clip_fused_kernel,
        grid=(1,),
        in_specs=in_specs,
        out_specs=out_specs,
        out_shape=out_shapes,
    )(*args)


# ---------------- forward (matches CLIPPretraining.forward) -------------------
def forward(params, x, grid, sentence, clip=False, return_embedding=False):
    # TODO(synk): SentenceTransformer tokenize + LLM forward not translatable;
    #             `sentence` is the precomputed (B, LLM_DIM) sentence embedding.
    B = x.shape[0]
    xf = x.reshape(B, -1)      # (B, im*im*T_C)  position-major / channel-minor
    gf = grid.reshape(B, -1)   # (B, im*im*2)
    args = [xf, gf, sentence] + [params[k] for k in PARAM_ORDER]
    out_shapes = (
        jax.ShapeDtypeStruct((B, IM_SIZE * IM_SIZE), jnp.float32),  # proj_up output
        jax.ShapeDtypeStruct((B, HALF), jnp.float32),               # x_emb
        jax.ShapeDtypeStruct((B, HALF), jnp.float32),               # sentence_emb
    )
    out, x_emb, s_emb = _fused_call(args, out_shapes)

    if return_embedding:
        cross = x_emb[:, :, None] * s_emb[:, None, :]      # bmm((B,16,1),(B,1,16))
        return (jnp.concatenate([s_emb[..., None], x_emb[..., None]], axis=-1), cross)
    elif clip:
        return x_emb[:, :, None] * s_emb[:, None, :]
    else:
        return out.reshape(B, 1, IM_SIZE, IM_SIZE)


# ---------------- deterministic parameter init (torch nn.Linear style) --------
def _uinit(key, shape, fan_in):
    lim = 1.0 / (fan_in ** 0.5)
    return jax.random.uniform(key, shape, jnp.float32, -lim, lim)


def init_params(key):
    keys = iter(jax.random.split(key, 64))
    nk = lambda: next(keys)

    def lin(fi, fo):
        return _uinit(nk(), (fi, fo), fi), _uinit(nk(), (1, fo), fi)

    # x_proj: Linear(IN_DIM,32) -> SiLU -> Linear(32,32) -> SiLU -> Linear(32,16)
    xw1_full, xb1 = lin(IN_DIM, EMBED_DIM)
    # split rows of the first weight to fold the cat(x, grid) into two dots.
    xw1_3d = xw1_full.reshape(IM_SIZE * IM_SIZE, T_C + 2, EMBED_DIM)
    xw1x = xw1_3d[:, :T_C, :].reshape(IM_SIZE * IM_SIZE * T_C, EMBED_DIM)
    xw1g = xw1_3d[:, T_C:, :].reshape(IM_SIZE * IM_SIZE * 2, EMBED_DIM)
    xw2, xb2 = lin(EMBED_DIM, EMBED_DIM)
    xw3, xb3 = lin(EMBED_DIM, HALF)

    # sentence_proj: Linear(384,32) -> ReLU -> Linear(32,32) -> ReLU -> Linear(32,16)
    sw1, sb1 = lin(LLM_DIM, EMBED_DIM)
    sw2, sb2 = lin(EMBED_DIM, EMBED_DIM)
    sw3, sb3 = lin(EMBED_DIM, HALF)

    # proj_up: Linear(32,128) -> SiLU -> Linear(128,256) -> SiLU -> Linear(256, im*im)
    pw1_full, pb1 = lin(EMBED_DIM, 128)
    pw1x = pw1_full[:HALF, :]          # rows for x_emb part of the concat
    pw1s = pw1_full[HALF:, :]          # rows for sentence_emb part
    pw2, pb2 = lin(128, 256)
    pw3, pb3 = lin(256, IM_SIZE * IM_SIZE)

    return dict(
        xw1x=xw1x, xw1g=xw1g, xb1=xb1, xw2=xw2, xb2=xb2, xw3=xw3, xb3=xb3,
        sw1=sw1, sb1=sb1, sw2=sw2, sb2=sb2, sw3=sw3, sb3=sb3,
        pw1x=pw1x, pw1s=pw1s, pb1=pb1, pw2=pw2, pb2=pb2, pw3=pw3, pb3=pb3,
    )


# ---------------- main ---------------------------------------------------------
if __name__ == "__main__":
    key = jax.random.PRNGKey(0)
    kp, kx, ks = jax.random.split(key, 3)
    params = init_params(kp)

    B = 2
    x = jax.random.normal(kx, (B, IM_SIZE, IM_SIZE, T_C), jnp.float32)
    gy, gxm = jnp.meshgrid(jnp.linspace(0.0, 1.0, IM_SIZE),
                           jnp.linspace(0.0, 1.0, IM_SIZE), indexing="ij")
    grid = jnp.broadcast_to(jnp.stack([gy, gxm], axis=-1)[None],
                            (B, IM_SIZE, IM_SIZE, 2)).astype(jnp.float32)
    sentence = jax.random.normal(ks, (B, LLM_DIM), jnp.float32)

    out = jax.jit(forward)(params, x, grid, sentence)
    out = jax.block_until_ready(out)
    assert out.shape == (B, 1, IM_SIZE, IM_SIZE)
    assert bool(jnp.all(jnp.isfinite(out)))
    print("KERNEL_OK")
</pallas_src>

<mosaic_0001>
module attributes {stable_mosaic.version = 11 : i64} {
  func.func @_clip_fused_kernel(%arg0: i32, %arg1: memref<2x2560xf32, #tpu.memory_space<vmem>>, %arg2: memref<2x512xf32, #tpu.memory_space<vmem>>, %arg3: memref<2x384xf32, #tpu.memory_space<vmem>>, %arg4: memref<2560x32xf32, #tpu.memory_space<vmem>>, %arg5: memref<512x32xf32, #tpu.memory_space<vmem>>, %arg6: memref<1x32xf32, #tpu.memory_space<vmem>>, %arg7: memref<32x32xf32, #tpu.memory_space<vmem>>, %arg8: memref<1x32xf32, #tpu.memory_space<vmem>>, %arg9: memref<32x16xf32, #tpu.memory_space<vmem>>, %arg10: memref<1x16xf32, #tpu.memory_space<vmem>>, %arg11: memref<384x32xf32, #tpu.memory_space<vmem>>, %arg12: memref<1x32xf32, #tpu.memory_space<vmem>>, %arg13: memref<32x32xf32, #tpu.memory_space<vmem>>, %arg14: memref<1x32xf32, #tpu.memory_space<vmem>>, %arg15: memref<32x16xf32, #tpu.memory_space<vmem>>, %arg16: memref<1x16xf32, #tpu.memory_space<vmem>>, %arg17: memref<16x128xf32, #tpu.memory_space<vmem>>, %arg18: memref<16x128xf32, #tpu.memory_space<vmem>>, %arg19: memref<1x128xf32, #tpu.memory_space<vmem>>, %arg20: memref<128x256xf32, #tpu.memory_space<vmem>>, %arg21: memref<1x256xf32, #tpu.memory_space<vmem>>, %arg22: memref<256x256xf32, #tpu.memory_space<vmem>>, %arg23: memref<1x256xf32, #tpu.memory_space<vmem>>, %arg24: memref<2x256xf32, #tpu.memory_space<vmem>>, %arg25: memref<2x16xf32, #tpu.memory_space<vmem>>, %arg26: memref<2x16xf32, #tpu.memory_space<vmem>>) attributes {dimension_semantics = [#tpu.dimension_semantics<arbitrary>], iteration_bounds = array<i64: 1>, scalar_prefetch = 0 : i64, scratch_operands = 0 : i64, tpu.core_type = #tpu.core_type<tc>, window_params = [{pipeline_mode = #tpu.pipeline_mode<synchronous>, transform_indices = @transform_0, window_bounds = array<i64: 2, 2560>}, {pipeline_mode = #tpu.pipeline_mode<synchronous>, transform_indices = @transform_1, window_bounds = array<i64: 2, 512>}, {pipeline_mode = #tpu.pipeline_mode<synchronous>, transform_indices = @transform_2, window_bounds = array<i64: 2, 384>}, {pipeline_mode = #tpu.pipeline_mode<synchronous>, transform_indices = @transform_3, window_bounds = array<i64: 2560, 32>}, {pipeline_mode = #tpu.pipeline_mode<synchronous>, transform_indices = @transform_4, window_bounds = array<i64: 512, 32>}, {pipeline_mode = #tpu.pipeline_mode<synchronous>, transform_indices = @transform_5, window_bounds = array<i64: 1, 32>}, {pipeline_mode = #tpu.pipeline_mode<synchronous>, transform_indices = @transform_6, window_bounds = array<i64: 32, 32>}, {pipeline_mode = #tpu.pipeline_mode<synchronous>, transform_indices = @transform_7, window_bounds = array<i64: 1, 32>}, {pipeline_mode = #tpu.pipeline_mode<synchronous>, transform_indices = @transform_8, window_bounds = array<i64: 32, 16>}, {pipeline_mode = #tpu.pipeline_mode<synchronous>, transform_indices = @transform_9, window_bounds = array<i64: 1, 16>}, {pipeline_mode = #tpu.pipeline_mode<synchronous>, transform_indices = @transform_10, window_bounds = array<i64: 384, 32>}, {pipeline_mode = #tpu.pipeline_mode<synchronous>, transform_indices = @transform_11, window_bounds = array<i64: 1, 32>}, {pipeline_mode = #tpu.pipeline_mode<synchronous>, transform_indices = @transform_12, window_bounds = array<i64: 32, 32>}, {pipeline_mode = #tpu.pipeline_mode<synchronous>, transform_indices = @transform_13, window_bounds = array<i64: 1, 32>}, {pipeline_mode = #tpu.pipeline_mode<synchronous>, transform_indices = @transform_14, window_bounds = array<i64: 32, 16>}, {pipeline_mode = #tpu.pipeline_mode<synchronous>, transform_indices = @transform_15, window_bounds = array<i64: 1, 16>}, {pipeline_mode = #tpu.pipeline_mode<synchronous>, transform_indices = @transform_16, window_bounds = array<i64: 16, 128>}, {pipeline_mode = #tpu.pipeline_mode<synchronous>, transform_indices = @transform_17, window_bounds = array<i64: 16, 128>}, {pipeline_mode = #tpu.pipeline_mode<synchronous>, transform_indices = @transform_18, window_bounds = array<i64: 1, 128>}, {pipeline_mode = #tpu.pipeline_mode<synchronous>, transform_indices = @transform_19, window_bounds = array<i64: 128, 256>}, {pipeline_mode = #tpu.pipeline_mode<synchronous>, transform_indices = @transform_20, window_bounds = array<i64: 1, 256>}, {pipeline_mode = #tpu.pipeline_mode<synchronous>, transform_indices = @transform_21, window_bounds = array<i64: 256, 256>}, {pipeline_mode = #tpu.pipeline_mode<synchronous>, transform_indices = @transform_22, window_bounds = array<i64: 1, 256>}, {pipeline_mode = #tpu.pipeline_mode<synchronous>, transform_indices = @transform_23, window_bounds = array<i64: 2, 256>}, {pipeline_mode = #tpu.pipeline_mode<synchronous>, transform_indices = @transform_24, window_bounds = array<i64: 2, 16>}, {pipeline_mode = #tpu.pipeline_mode<synchronous>, transform_indices = @transform_25, window_bounds = array<i64: 2, 16>}]} {
    %c0 = arith.constant 0 : index
    %c0_0 = arith.constant 0 : index
    %0 = vector.load %arg1[%c0, %c0_0] : memref<2x2560xf32, #tpu.memory_space<vmem>>, vector<2x2560xf32>
    %c0_1 = arith.constant 0 : index
    %c0_2 = arith.constant 0 : index
    %1 = vector.load %arg4[%c0_1, %c0_2] : memref<2560x32xf32, #tpu.memory_space<vmem>>, vector<2560x32xf32>
    %cst = arith.constant dense<0.000000e+00> : vector<2x32xf32>
    %2 = tpu.matmul %0, %1, %cst {dimension_numbers = #tpu.dot_dimension_numbers<[1], [0], [0], [1], [0, 0, 1, 1], [], []>} : vector<2x2560xf32>, vector<2560x32xf32>, vector<2x32xf32> -> vector<2x32xf32>
    %c0_3 = arith.constant 0 : index
    %c0_4 = arith.constant 0 : index
    %3 = vector.load %arg2[%c0_3, %c0_4] : memref<2x512xf32, #tpu.memory_space<vmem>>, vector<2x512xf32>
    %c0_5 = arith.constant 0 : index
    %c0_6 = arith.constant 0 : index
    %4 = vector.load %arg5[%c0_5, %c0_6] : memref<512x32xf32, #tpu.memory_space<vmem>>, vector<512x32xf32>
    %cst_7 = arith.constant dense<0.000000e+00> : vector<2x32xf32>
    %5 = tpu.matmul %3, %4, %cst_7 {dimension_numbers = #tpu.dot_dimension_numbers<[1], [0], [0], [1], [0, 0, 1, 1], [], []>} : vector<2x512xf32>, vector<512x32xf32>, vector<2x32xf32> -> vector<2x32xf32>
    %6 = arith.addf %2, %5 : vector<2x32xf32>
    %c0_8 = arith.constant 0 : index
    %c0_9 = arith.constant 0 : index
    %7 = vector.load %arg6[%c0_8, %c0_9] : memref<1x32xf32, #tpu.memory_space<vmem>>, vector<1x32xf32>
    %8 = vector.broadcast %7 : vector<1x32xf32> to vector<2x32xf32>
    %9 = arith.addf %6, %8 : vector<2x32xf32>
    %10 = arith.negf %9 : vector<2x32xf32>
    %11 = math.exp %10 : vector<2x32xf32>
    %cst_10 = arith.constant 1.000000e+00 : f32
    %12 = vector.broadcast %cst_10 : f32 to vector<2x32xf32>
    %13 = arith.addf %12, %11 : vector<2x32xf32>
    %14 = arith.divf %12, %13 : vector<2x32xf32>
    %15 = arith.mulf %9, %14 : vector<2x32xf32>
    %c0_11 = arith.constant 0 : index
    %c0_12 = arith.constant 0 : index
    %16 = vector.load %arg7[%c0_11, %c0_12] : memref<32x32xf32, #tpu.memory_space<vmem>>, vector<32x32xf32>
    %cst_13 = arith.constant dense<0.000000e+00> : vector<2x32xf32>
    %17 = tpu.matmul %15, %16, %cst_13 {dimension_numbers = #tpu.dot_dimension_numbers<[1], [0], [0], [1], [0, 0, 1, 1], [], []>} : vector<2x32xf32>, vector<32x32xf32>, vector<2x32xf32> -> vector<2x32xf32>
    %c0_14 = arith.constant 0 : index
    %c0_15 = arith.constant 0 : index
    %18 = vector.load %arg8[%c0_14, %c0_15] : memref<1x32xf32, #tpu.memory_space<vmem>>, vector<1x32xf32>
    %19 = vector.broadcast %18 : vector<1x32xf32> to vector<2x32xf32>
    %20 = arith.addf %17, %19 : vector<2x32xf32>
    %21 = arith.negf %20 : vector<2x32xf32>
    %22 = math.exp %21 : vector<2x32xf32>
    %cst_16 = arith.constant 1.000000e+00 : f32
    %23 = vector.broadcast %cst_16 : f32 to vector<2x32xf32>
    %24 = arith.addf %23, %22 : vector<2x32xf32>
    %25 = arith.divf %23, %24 : vector<2x32xf32>
    %26 = arith.mulf %20, %25 : vector<2x32xf32>
    %c0_17 = arith.constant 0 : index
    %c0_18 = arith.constant 0 : index
    %27 = vector.load %arg9[%c0_17, %c0_18] : memref<32x16xf32, #tpu.memory_space<vmem>>, vector<32x16xf32>
    %cst_19 = arith.constant dense<0.000000e+00> : vector<2x16xf32>
    %28 = tpu.matmul %26, %27, %cst_19 {dimension_numbers = #tpu.dot_dimension_numbers<[1], [0], [0], [1], [0, 0, 1, 1], [], []>} : vector<2x32xf32>, vector<32x16xf32>, vector<2x16xf32> -> vector<2x16xf32>
    %c0_20 = arith.constant 0 : index
    %c0_21 = arith.constant 0 : index
    %29 = vector.load %arg10[%c0_20, %c0_21] : memref<1x16xf32, #tpu.memory_space<vmem>>, vector<1x16xf32>
    %30 = vector.broadcast %29 : vector<1x16xf32> to vector<2x16xf32>
    %31 = arith.addf %28, %30 : vector<2x16xf32>
    %c0_22 = arith.constant 0 : index
    %c0_23 = arith.constant 0 : index
    %32 = vector.load %arg3[%c0_22, %c0_23] : memref<2x384xf32, #tpu.memory_space<vmem>>, vector<2x384xf32>
    %c0_24 = arith.constant 0 : index
    %c0_25 = arith.constant 0 : index
    %33 = vector.load %arg11[%c0_24, %c0_25] : memref<384x32xf32, #tpu.memory_space<vmem>>, vector<384x32xf32>
    %cst_26 = arith.constant dense<0.000000e+00> : vector<2x32xf32>
    %34 = tpu.matmul %32, %33, %cst_26 {dimension_numbers = #tpu.dot_dimension_numbers<[1], [0], [0], [1], [0, 0, 1, 1], [], []>} : vector<2x384xf32>, vector<384x32xf32>, vector<2x32xf32> -> vector<2x32xf32>
    %c0_27 = arith.constant 0 : index
    %c0_28 = arith.constant 0 : index
    %35 = vector.load %arg12[%c0_27, %c0_28] : memref<1x32xf32, #tpu.memory_space<vmem>>, vector<1x32xf32>
    %36 = vector.broadcast %35 : vector<1x32xf32> to vector<2x32xf32>
    %37 = arith.addf %34, %36 : vector<2x32xf32>
    %cst_29 = arith.constant 0.000000e+00 : f32
    %38 = vector.broadcast %cst_29 : f32 to vector<2x32xf32>
    %39 = arith.maximumf %37, %38 : vector<2x32xf32>
    %c0_30 = arith.constant 0 : index
    %c0_31 = arith.constant 0 : index
    %40 = vector.load %arg13[%c0_30, %c0_31] : memref<32x32xf32, #tpu.memory_space<vmem>>, vector<32x32xf32>
    %cst_32 = arith.constant dense<0.000000e+00> : vector<2x32xf32>
    %41 = tpu.matmul %39, %40, %cst_32 {dimension_numbers = #tpu.dot_dimension_numbers<[1], [0], [0], [1], [0, 0, 1, 1], [], []>} : vector<2x32xf32>, vector<32x32xf32>, vector<2x32xf32> -> vector<2x32xf32>
    %c0_33 = arith.constant 0 : index
    %c0_34 = arith.constant 0 : index
    %42 = vector.load %arg14[%c0_33, %c0_34] : memref<1x32xf32, #tpu.memory_space<vmem>>, vector<1x32xf32>
    %43 = vector.broadcast %42 : vector<1x32xf32> to vector<2x32xf32>
    %44 = arith.addf %41, %43 : vector<2x32xf32>
    %cst_35 = arith.constant 0.000000e+00 : f32
    %45 = vector.broadcast %cst_35 : f32 to vector<2x32xf32>
    %46 = arith.maximumf %44, %45 : vector<2x32xf32>
    %c0_36 = arith.constant 0 : index
    %c0_37 = arith.constant 0 : index
    %47 = vector.load %arg15[%c0_36, %c0_37] : memref<32x16xf32, #tpu.memory_space<vmem>>, vector<32x16xf32>
    %cst_38 = arith.constant dense<0.000000e+00> : vector<2x16xf32>
    %48 = tpu.matmul %46, %47, %cst_38 {dimension_numbers = #tpu.dot_dimension_numbers<[1], [0], [0], [1], [0, 0, 1, 1], [], []>} : vector<2x32xf32>, vector<32x16xf32>, vector<2x16xf32> -> vector<2x16xf32>
    %c0_39 = arith.constant 0 : index
    %c0_40 = arith.constant 0 : index
    %49 = vector.load %arg16[%c0_39, %c0_40] : memref<1x16xf32, #tpu.memory_space<vmem>>, vector<1x16xf32>
    %50 = vector.broadcast %49 : vector<1x16xf32> to vector<2x16xf32>
    %51 = arith.addf %48, %50 : vector<2x16xf32>
    %c0_41 = arith.constant 0 : index
    %c0_42 = arith.constant 0 : index
    %52 = vector.load %arg17[%c0_41, %c0_42] : memref<16x128xf32, #tpu.memory_space<vmem>>, vector<16x128xf32>
    %cst_43 = arith.constant dense<0.000000e+00> : vector<2x128xf32>
    %53 = tpu.matmul %31, %52, %cst_43 {dimension_numbers = #tpu.dot_dimension_numbers<[1], [0], [0], [1], [0, 0, 1, 1], [], []>} : vector<2x16xf32>, vector<16x128xf32>, vector<2x128xf32> -> vector<2x128xf32>
    %c0_44 = arith.constant 0 : index
    %c0_45 = arith.constant 0 : index
    %54 = vector.load %arg18[%c0_44, %c0_45] : memref<16x128xf32, #tpu.memory_space<vmem>>, vector<16x128xf32>
    %cst_46 = arith.constant dense<0.000000e+00> : vector<2x128xf32>
    %55 = tpu.matmul %51, %54, %cst_46 {dimension_numbers = #tpu.dot_dimension_numbers<[1], [0], [0], [1], [0, 0, 1, 1], [], []>} : vector<2x16xf32>, vector<16x128xf32>, vector<2x128xf32> -> vector<2x128xf32>
    %56 = arith.addf %53, %55 : vector<2x128xf32>
    %c0_47 = arith.constant 0 : index
    %c0_48 = arith.constant 0 : index
    %57 = vector.load %arg19[%c0_47, %c0_48] : memref<1x128xf32, #tpu.memory_space<vmem>>, vector<1x128xf32>
    %58 = vector.broadcast %57 : vector<1x128xf32> to vector<2x128xf32>
    %59 = arith.addf %56, %58 : vector<2x128xf32>
    %60 = arith.negf %59 : vector<2x128xf32>
    %61 = math.exp %60 : vector<2x128xf32>
    %cst_49 = arith.constant 1.000000e+00 : f32
    %62 = vector.broadcast %cst_49 : f32 to vector<2x128xf32>
    %63 = arith.addf %62, %61 : vector<2x128xf32>
    %64 = arith.divf %62, %63 : vector<2x128xf32>
    %65 = arith.mulf %59, %64 : vector<2x128xf32>
    %c0_50 = arith.constant 0 : index
    %c0_51 = arith.constant 0 : index
    %66 = vector.load %arg20[%c0_50, %c0_51] : memref<128x256xf32, #tpu.memory_space<vmem>>, vector<128x256xf32>
    %cst_52 = arith.constant dense<0.000000e+00> : vector<2x256xf32>
    %67 = tpu.matmul %65, %66, %cst_52 {dimension_numbers = #tpu.dot_dimension_numbers<[1], [0], [0], [1], [0, 0, 1, 1], [], []>} : vector<2x128xf32>, vector<128x256xf32>, vector<2x256xf32> -> vector<2x256xf32>
    %c0_53 = arith.constant 0 : index
    %c0_54 = arith.constant 0 : index
    %68 = vector.load %arg21[%c0_53, %c0_54] : memref<1x256xf32, #tpu.memory_space<vmem>>, vector<1x256xf32>
    %69 = vector.broadcast %68 : vector<1x256xf32> to vector<2x256xf32>
    %70 = arith.addf %67, %69 : vector<2x256xf32>
    %71 = arith.negf %70 : vector<2x256xf32>
    %72 = math.exp %71 : vector<2x256xf32>
    %cst_55 = arith.constant 1.000000e+00 : f32
    %73 = vector.broadcast %cst_55 : f32 to vector<2x256xf32>
    %74 = arith.addf %73, %72 : vector<2x256xf32>
    %75 = arith.divf %73, %74 : vector<2x256xf32>
    %76 = arith.mulf %70, %75 : vector<2x256xf32>
    %c0_56 = arith.constant 0 : index
    %c0_57 = arith.constant 0 : index
    %77 = vector.load %arg22[%c0_56, %c0_57] : memref<256x256xf32, #tpu.memory_space<vmem>>, vector<256x256xf32>
    %cst_58 = arith.constant dense<0.000000e+00> : vector<2x256xf32>
    %78 = tpu.matmul %76, %77, %cst_58 {dimension_numbers = #tpu.dot_dimension_numbers<[1], [0], [0], [1], [0, 0, 1, 1], [], []>} : vector<2x256xf32>, vector<256x256xf32>, vector<2x256xf32> -> vector<2x256xf32>
    %c0_59 = arith.constant 0 : index
    %c0_60 = arith.constant 0 : index
    %79 = vector.load %arg23[%c0_59, %c0_60] : memref<1x256xf32, #tpu.memory_space<vmem>>, vector<1x256xf32>
    %80 = vector.broadcast %79 : vector<1x256xf32> to vector<2x256xf32>
    %81 = arith.addf %78, %80 : vector<2x256xf32>
    %c0_61 = arith.constant 0 : index
    %c0_62 = arith.constant 0 : index
    %82 = vector.load %arg24[%c0_61, %c0_62] : memref<2x256xf32, #tpu.memory_space<vmem>>, vector<2x256xf32>
    tpu.vector_store %arg24[%c0_61, %c0_62], %81 {strides = array<i32>} : memref<2x256xf32, #tpu.memory_space<vmem>>, vector<2x256xf32>,
    %c0_63 = arith.constant 0 : index
    %c0_64 = arith.constant 0 : index
    %83 = vector.load %arg25[%c0_63, %c0_64] : memref<2x16xf32, #tpu.memory_space<vmem>>, vector<2x16xf32>
    tpu.vector_store %arg25[%c0_63, %c0_64], %31 {strides = array<i32>} : memref<2x16xf32, #tpu.memory_space<vmem>>, vector<2x16xf32>,
    %c0_65 = arith.constant 0 : index
    %c0_66 = arith.constant 0 : index
    %84 = vector.load %arg26[%c0_65, %c0_66] : memref<2x16xf32, #tpu.memory_space<vmem>>, vector<2x16xf32>
    tpu.vector_store %arg26[%c0_65, %c0_66], %51 {strides = array<i32>} : memref<2x16xf32, #tpu.memory_space<vmem>>, vector<2x16xf32>,
    return
  }
  func.func @transform_0(%arg0: i32) -> (i32, i32) {
    %c0_i32 = arith.constant 0 : i32
    %c0_i32_0 = arith.constant 0 : i32
    %c0_i32_1 = arith.constant 0 : i32
    return %c0_i32, %c0_i32_0 : i32, i32
  }
  func.func @transform_1(%arg0: i32) -> (i32, i32) {
    %c0_i32 = arith.constant 0 : i32
    %c0_i32_0 = arith.constant 0 : i32
    %c0_i32_1 = arith.constant 0 : i32
    return %c0_i32, %c0_i32_0 : i32, i32
  }
  func.func @transform_2(%arg0: i32) -> (i32, i32) {
    %c0_i32 = arith.constant 0 : i32
    %c0_i32_0 = arith.constant 0 : i32
    %c0_i32_1 = arith.constant 0 : i32
    return %c0_i32, %c0_i32_0 : i32, i32
  }
  func.func @transform_3(%arg0: i32) -> (i32, i32) {
    %c0_i32 = arith.constant 0 : i32
    %c0_i32_0 = arith.constant 0 : i32
    %c0_i32_1 = arith.constant 0 : i32
    return %c0_i32, %c0_i32_0 : i32, i32
  }
  func.func @transform_4(%arg0: i32) -> (i32, i32) {
    %c0_i32 = arith.constant 0 : i32
    %c0_i32_0 = arith.constant 0 : i32
    %c0_i32_1 = arith.constant 0 : i32
    return %c0_i32, %c0_i32_0 : i32, i32
  }
  func.func @transform_5(%arg0: i32) -> (i32, i32) {
    %c0_i32 = arith.constant 0 : i32
    %c0_i32_0 = arith.constant 0 : i32
    %c0_i32_1 = arith.constant 0 : i32
    return %c0_i32, %c0_i32_0 : i32, i32
  }
  func.func @transform_6(%arg0: i32) -> (i32, i32) {
    %c0_i32 = arith.constant 0 : i32
    %c0_i32_0 = arith.constant 0 : i32
    %c0_i32_1 = arith.constant 0 : i32
    return %c0_i32, %c0_i32_0 : i32, i32
  }
  func.func @transform_7(%arg0: i32) -> (i32, i32) {
    %c0_i32 = arith.constant 0 : i32
    %c0_i32_0 = arith.constant 0 : i32
    %c0_i32_1 = arith.constant 0 : i32
    return %c0_i32, %c0_i32_0 : i32, i32
  }
  func.func @transform_8(%arg0: i32) -> (i32, i32) {
    %c0_i32 = arith.constant 0 : i32
    %c0_i32_0 = arith.constant 0 : i32
    %c0_i32_1 = arith.constant 0 : i32
    return %c0_i32, %c0_i32_0 : i32, i32
  }
  func.func @transform_9(%arg0: i32) -> (i32, i32) {
    %c0_i32 = arith.constant 0 : i32
    %c0_i32_0 = arith.constant 0 : i32
    %c0_i32_1 = arith.constant 0 : i32
    return %c0_i32, %c0_i32_0 : i32, i32
  }
  func.func @transform_10(%arg0: i32) -> (i32, i32) {
    %c0_i32 = arith.constant 0 : i32
    %c0_i32_0 = arith.constant 0 : i32
    %c0_i32_1 = arith.constant 0 : i32
    return %c0_i32, %c0_i32_0 : i32, i32
  }
  func.func @transform_11(%arg0: i32) -> (i32, i32) {
    %c0_i32 = arith.constant 0 : i32
    %c0_i32_0 = arith.constant 0 : i32
    %c0_i32_1 = arith.constant 0 : i32
    return %c0_i32, %c0_i32_0 : i32, i32
  }
  func.func @transform_12(%arg0: i32) -> (i32, i32) {
    %c0_i32 = arith.constant 0 : i32
    %c0_i32_0 = arith.constant 0 : i32
    %c0_i32_1 = arith.constant 0 : i32
    return %c0_i32, %c0_i32_0 : i32, i32
  }
  func.func @transform_13(%arg0: i32) -> (i32, i32) {
    %c0_i32 = arith.constant 0 : i32
    %c0_i32_0 = arith.constant 0 : i32
    %c0_i32_1 = arith.constant 0 : i32
    return %c0_i32, %c0_i32_0 : i32, i32
  }
  func.func @transform_14(%arg0: i32) -> (i32, i32) {
    %c0_i32 = arith.constant 0 : i32
    %c0_i32_0 = arith.constant 0 : i32
    %c0_i32_1 = arith.constant 0 : i32
    return %c0_i32, %c0_i32_0 : i32, i32
  }
  func.func @transform_15(%arg0: i32) -> (i32, i32) {
    %c0_i32 = arith.constant 0 : i32
    %c0_i32_0 = arith.constant 0 : i32
    %c0_i32_1 = arith.constant 0 : i32
    return %c0_i32, %c0_i32_0 : i32, i32
  }
  func.func @transform_16(%arg0: i32) -> (i32, i32) {
    %c0_i32 = arith.constant 0 : i32
    %c0_i32_0 = arith.constant 0 : i32
    %c0_i32_1 = arith.constant 0 : i32
    return %c0_i32, %c0_i32_0 : i32, i32
  }
  func.func @transform_17(%arg0: i32) -> (i32, i32) {
    %c0_i32 = arith.constant 0 : i32
    %c0_i32_0 = arith.constant 0 : i32
    %c0_i32_1 = arith.constant 0 : i32
    return %c0_i32, %c0_i32_0 : i32, i32
  }
  func.func @transform_18(%arg0: i32) -> (i32, i32) {
    %c0_i32 = arith.constant 0 : i32
    %c0_i32_0 = arith.constant 0 : i32
    %c0_i32_1 = arith.constant 0 : i32
    return %c0_i32, %c0_i32_0 : i32, i32
  }
  func.func @transform_19(%arg0: i32) -> (i32, i32) {
    %c0_i32 = arith.constant 0 : i32
    %c0_i32_0 = arith.constant 0 : i32
    %c0_i32_1 = arith.constant 0 : i32
    return %c0_i32, %c0_i32_0 : i32, i32
  }
  func.func @transform_20(%arg0: i32) -> (i32, i32) {
    %c0_i32 = arith.constant 0 : i32
    %c0_i32_0 = arith.constant 0 : i32
    %c0_i32_1 = arith.constant 0 : i32
    return %c0_i32, %c0_i32_0 : i32, i32
  }
  func.func @transform_21(%arg0: i32) -> (i32, i32) {
    %c0_i32 = arith.constant 0 : i32
    %c0_i32_0 = arith.constant 0 : i32
    %c0_i32_1 = arith.constant 0 : i32
    return %c0_i32, %c0_i32_0 : i32, i32
  }
  func.func @transform_22(%arg0: i32) -> (i32, i32) {
    %c0_i32 = arith.constant 0 : i32
    %c0_i32_0 = arith.constant 0 : i32
    %c0_i32_1 = arith.constant 0 : i32
    return %c0_i32, %c0_i32_0 : i32, i32
  }
  func.func @transform_23(%arg0: i32) -> (i32, i32) {
    %c0_i32 = arith.constant 0 : i32
    %c0_i32_0 = arith.constant 0 : i32
    %c0_i32_1 = arith.constant 0 : i32
    return %c0_i32, %c0_i32_0 : i32, i32
  }
  func.func @transform_24(%arg0: i32) -> (i32, i32) {
    %c0_i32 = arith.constant 0 : i32
    %c0_i32_0 = arith.constant 0 : i32
    %c0_i32_1 = arith.constant 0 : i32
    return %c0_i32, %c0_i32_0 : i32, i32
  }
  func.func @transform_25(%arg0: i32) -> (i32, i32) {
    %c0_i32 = arith.constant 0 : i32
    %c0_i32_0 = arith.constant 0 : i32
    %c0_i32_1 = arith.constant 0 : i32
    return %c0_i32, %c0_i32_0 : i32, i32
  }
}

</mosaic_0001>

<bundles_post_ra>
// kernel: forward.1
= control target key start
LH: loop header
LB: loop body
LE: loop exit
PB: predicated region body
PF: predicated region fallthrough
CT: control target
= control target key end

     0   :  { %s5117_s0 = inlined_call_operand.vmem [shape: f32[2,2560], index: 0, kind: input, shape index: {}]   ;;  %s5118_s1 = inlined_call_operand.vmem [shape: f32[2,512], index: 1, kind: input, shape index: {}]   ;;  %s5119_s2 = inlined_call_operand.vmem [shape: f32[2,384], index: 2, kind: input, shape index: {}]   ;;  %s5120_s3 = inlined_call_operand.vmem [shape: f32[2560,32], index: 3, kind: input, shape index: {}]   ;;  %s5121_s4 = inlined_call_operand.vmem [shape: f32[512,32], index: 4, kind: input, shape index: {}]   ;;  %s5122_s5 = inlined_call_operand.vmem [shape: f32[1,32], index: 5, kind: input, shape index: {}]   ;;  %s5123_s6 = inlined_call_operand.vmem [shape: f32[32,32], index: 6, kind: input, shape index: {}]   ;;  %s5124_s7 = inlined_call_operand.vmem [shape: f32[1,32], index: 7, kind: input, shape index: {}]   ;;  %s5125_s8 = inlined_call_operand.vmem [shape: f32[32,16], index: 8, kind: input, shape index: {}]   ;;  %s5126_s9 = inlined_call_operand.vmem [shape: f32[1,16], index: 9, kind: input, shape index: {}]   ;;  %s5127_s10 = inlined_call_operand.vmem [shape: f32[384,32], index: 10, kind: input, shape index: {}]   ;;  %s5128_s11 = inlined_call_operand.vmem [shape: f32[1,32], index: 11, kind: input, shape index: {}]   ;;  %s5129_s12 = inlined_call_operand.vmem [shape: f32[32,32], index: 12, kind: input, shape index: {}]   ;;  %s5130_s13 = inlined_call_operand.vmem [shape: f32[1,32], index: 13, kind: input, shape index: {}]   ;;  %s5131_s14 = inlined_call_operand.vmem [shape: f32[32,16], index: 14, kind: input, shape index: {}]   ;;  %s5132_s15 = inlined_call_operand.vmem [shape: f32[1,16], index: 15, kind: input, shape index: {}]   ;;  %s5133_s16 = inlined_call_operand.vmem [shape: f32[16,128], index: 16, kind: input, shape index: {}]   ;;  %s5134_s17 = inlined_call_operand.vmem [shape: f32[16,128], index: 17, kind: input, shape index: {}]   ;;  %s5135_s18 = inlined_call_operand.vmem [shape: f32[1,128], index: 18, kind: input, shape index: {}]   ;;  %s5136_s19 = inlined_call_operand.vmem [shape: f32[128,256], index: 19, kind: input, shape index: {}]   ;;  %s5137_s20 = inlined_call_operand.vmem [shape: f32[1,256], index: 20, kind: input, shape index: {}]   ;;  %s5138_s21 = inlined_call_operand.vmem [shape: f32[256,256], index: 21, kind: input, shape index: {}]   ;;  %s5139_s22 = inlined_call_operand.vmem [shape: f32[1,256], index: 22, kind: input, shape index: {}]   ;;  %s5140_s23 = inlined_call_operand.vmem [shape: f32[2,256], index: 23, kind: output, shape index: {0}]   ;;  %s5141_s24 = inlined_call_operand.hbm [shape: f32[2,16], index: 24, kind: output, shape index: {1}]   ;;  %s5142_s25 = inlined_call_operand.hbm [shape: f32[2,16], index: 25, kind: output, shape index: {2}]  }
   0x1   :  { %5148 = sst [smem:[#allocation8_spill]] %s5117_s0 }
   0x2   :  { %5149 = sst [smem:[#allocation9_spill]] %s5118_s1 }
   0x3   :  { %5150 = sst [smem:[#allocation10_spill]] %s5119_s2 }
   0x4   :  { %5151 = sst [smem:[#allocation11_spill]] %s5120_s3 }
   0x5   :  { %5152 = sst [smem:[#allocation12_spill]] %s5121_s4 }
   0x6   :  { %5153 = sst [smem:[#allocation13_spill]] %s5122_s5 }
   0x7   :  { %5154 = sst [smem:[#allocation14_spill]] %s5123_s6 }
   0x8   :  { %5155 = sst [smem:[#allocation15_spill]] %s5124_s7 }
   0x9   :  { %5156 = sst [smem:[#allocation16_spill]] %s5125_s8 }
   0xa   :  { %5157 = sst [smem:[#allocation17_spill]] %s5126_s9 }
   0xb   :  { %31 = vsyncpa [#allocation3], 0  ;;  %s5158_s6 = sld [smem:[#allocation12_spill]]  ;;  %v3193_v30 = vmov 1983009808   ;;  %v474_v32 = vlaneseq }
   0xc   :  { %v472_v31 = vunpack.c.l.s4 %v3193_v30  ;;  %s5159_s29 = sld [smem:[#allocation9_spill]] }
   0xd   :  { %v3442_v42 = vshrl.u32 %v474_v32, 7  ;;  %s5160_s8 = sld [smem:[#allocation11_spill]] }
   0xe   :  { %v473_v41 = vunpack.c.0.s8 %v472_v31  ;;  %s5161_s5 = sld [smem:[#allocation8_spill]] }
  0x10   :  { %v3469_v51 = vsub.s32 %v473_v41, %v3442_v42 }
  0x11   :  { %v436_v0 = vld [vmem:[%s5158_s6 + $0xf8] sm:$0xff]  ;;  %v435_v4 = vld [vmem:[%s5158_s6 + $0xf0] sm:$0xff]  ;;  %v434_v8 = vld [vmem:[%s5158_s6 + $0xe8] sm:$0xff] }
  0x12   :  { %v468_v1 = vld [vmem:[%s5158_s6 + $0x1f8] sm:$0xff]  ;;  %2526 = vmatprep.subr.mxu0 %v436_v0  ;;  %v467_v5 = vld [vmem:[%s5158_s6 + $0x1f0] sm:$0xff]  ;;  %v466_v9 = vld [vmem:[%s5158_s6 + $0x1e8] sm:$0xff] }
  0x13   :  { %v420_v2 = vld [vmem:[%s5158_s6 + $0x78] sm:$0xff]  ;;  %2561 = vmatprep.subr.mxu1 %v468_v1  ;;  %v419_v6 = vld [vmem:[%s5158_s6 + $0x70] sm:$0xff]  ;;  %v418_v10 = vld [vmem:[%s5158_s6 + $0x68] sm:$0xff] }
  0x14   :  { %v452_v3 = vld [vmem:[%s5158_s6 + $0x178] sm:$0xff]  ;;  %2527 = vmatpush3.msra.mxu0 %v420_v2  ;;  %v451_v7 = vld [vmem:[%s5158_s6 + $0x170] sm:$0xff]  ;;  %v450_v11 = vld [vmem:[%s5158_s6 + $0x168] sm:$0xff] }
  0x15   :  { %2562 = vmatpush3.msra.mxu1 %v452_v3  ;;  %2528 = vmatprep.subr.mxu0 %v435_v4  ;;  %v433_v12 = vld [vmem:[%s5158_s6 + $0xe0] sm:$0xff]  ;;  %v432_v16 = vld [vmem:[%s5158_s6 + $0xd8] sm:$0xff]  ;;  %v431_v20 = vld [vmem:[%s5158_s6 + $0xd0] sm:$0xff] }
  0x16   :  { %2563 = vmatprep.subr.mxu1 %v467_v5  ;;  %2529 = vmatpush3.msra.mxu0 %v419_v6  ;;  %v465_v13 = vld [vmem:[%s5158_s6 + $0x1e0] sm:$0xff]  ;;  %v464_v17 = vld [vmem:[%s5158_s6 + $0x1d8] sm:$0xff]  ;;  %v463_v21 = vld [vmem:[%s5158_s6 + $0x1d0] sm:$0xff] }
  0x17   :  { %2564 = vmatpush3.msra.mxu1 %v451_v7  ;;  %2530 = vmatprep.subr.mxu0 %v434_v8  ;;  %v417_v14 = vld [vmem:[%s5158_s6 + $0x60] sm:$0xff]  ;;  %v416_v18 = vld [vmem:[%s5158_s6 + $0x58] sm:$0xff]  ;;  %v415_v22 = vld [vmem:[%s5158_s6 + $0x50] sm:$0xff] }
  0x18   :  { %2565 = vmatprep.subr.mxu1 %v466_v9  ;;  %v449_v15 = vld [vmem:[%s5158_s6 + $0x160] sm:$0xff]  ;;  %2531 = vmatpush3.msra.mxu0 %v418_v10  ;;  %v448_v19 = vld [vmem:[%s5158_s6 + $0x158] sm:$0xff]  ;;  %v447_v23 = vld [vmem:[%s5158_s6 + $0x150] sm:$0xff] }
  0x19   :  { %2566 = vmatpush3.msra.mxu1 %v450_v11  ;;  %2532 = vmatprep.subr.mxu0 %v433_v12  ;;  %v430_v24 = vld [vmem:[%s5158_s6 + $0xc8] sm:$0xff]  ;;  %v429_v28 = vld [vmem:[%s5158_s6 + $0xc0] sm:$0xff]  ;;  %v428_v35 = vld [vmem:[%s5158_s6 + $0xb8] sm:$0xff] }
  0x1a   :  { %2567 = vmatprep.subr.mxu1 %v465_v13  ;;  %2533 = vmatpush3.msra.mxu0 %v417_v14  ;;  %v462_v25 = vld [vmem:[%s5158_s6 + $0x1c8] sm:$0xff]  ;;  %v461_v29 = vld [vmem:[%s5158_s6 + $0x1c0] sm:$0xff]  ;;  %v460_v36 = vld [vmem:[%s5158_s6 + $0x1b8] sm:$0xff] }
  0x1b   :  { %2568 = vmatpush3.msra.mxu1 %v449_v15  ;;  %2534 = vmatprep.subr.mxu0 %v432_v16  ;;  %v414_v26 = vld [vmem:[%s5158_s6 + $0x48] sm:$0xff]  ;;  %v413_v33 = vld [vmem:[%s5158_s6 + $0x40] sm:$0xff]  ;;  %v412_v37 = vld [vmem:[%s5158_s6 + $0x38] sm:$0xff] }
  0x1c   :  { %2569 = vmatprep.subr.mxu1 %v464_v17  ;;  %2535 = vmatpush3.msra.mxu0 %v416_v18  ;;  %v446_v27 = vld [vmem:[%s5158_s6 + $0x148] sm:$0xff]  ;;  %v445_v34 = vld [vmem:[%s5158_s6 + $0x140] sm:$0xff]  ;;  %v444_v38 = vld [vmem:[%s5158_s6 + $0x138] sm:$0xff] }
  0x1d   :  { %2570 = vmatpush3.msra.mxu1 %v448_v19  ;;  %2536 = vmatprep.subr.mxu0 %v431_v20  ;;  %v427_v39 = vld [vmem:[%s5158_s6 + $0xb0] sm:$0xff]  ;;  %v426_v45 = vld [vmem:[%s5158_s6 + $0xa8] sm:$0xff]  ;;  %v425_v49 = vld [vmem:[%s5158_s6 + $0xa0] sm:$0xff] }
  0x1e   :  { %2571 = vmatprep.subr.mxu1 %v463_v21  ;;  %2537 = vmatpush3.msra.mxu0 %v415_v22  ;;  %v459_v40 = vld [vmem:[%s5158_s6 + $0x1b0] sm:$0xff]  ;;  %v458_v46 = vld [vmem:[%s5158_s6 + $0x1a8] sm:$0xff]  ;;  %v457_v50 = vld [vmem:[%s5158_s6 + $0x1a0] sm:$0xff] }
  0x1f   :  { %2572 = vmatpush3.msra.mxu1 %v447_v23  ;;  %2538 = vmatprep.subr.mxu0 %v430_v24  ;;  %v411_v43 = vld [vmem:[%s5158_s6 + $0x30] sm:$0xff]  ;;  %v410_v47 = vld [vmem:[%s5158_s6 + $0x28] sm:$0xff]  ;;  %v409_v52 = vld [vmem:[%s5158_s6 + $0x20] sm:$0xff] }
  0x20   :  { %2573 = vmatprep.subr.mxu1 %v462_v25  ;;  %2539 = vmatpush3.msra.mxu0 %v414_v26  ;;  %v443_v44 = vld [vmem:[%s5158_s6 + $0x130] sm:$0xff]  ;;  %v442_v48 = vld [vmem:[%s5158_s6 + $0x128] sm:$0xff]  ;;  %v441_v53 = vld [vmem:[%s5158_s6 + $0x120] sm:$0xff] }
  0x21   :  { %2574 = vmatpush3.msra.mxu1 %v446_v27  ;;  %2540 = vmatprep.subr.mxu0 %v429_v28  ;;  %v404_v54 = vld [vmem:[%s5159_s29] sm:$0xff]  ;;  %v424_v55 = vld [vmem:[%s5158_s6 + $0x98] sm:$0xff]  ;;  %v423_v60 = vld [vmem:[%s5158_s6 + $0x90] sm:$0xff] }
  0x22   :  { %2575 = vmatprep.subr.mxu1 %v461_v29  ;;  %2541 = vmatpush3.msra.mxu0 %v413_v33  ;;  %v456_v56 = vld [vmem:[%s5158_s6 + $0x198] sm:$0xff]  ;;  %v470_v57 = vcombine.high %v404_v54, %v404_v54  ;;  %v455_v61 = vld [vmem:[%s5158_s6 + $0x190] sm:$0xff]  ;;  %v477_v62 = vrot.slane %v404_v54, %v3469_v51  ;;  %v422_v2 = vld [vmem:[%s5158_s6 + $0x88] sm:$0xff] }
  0x23   :  { %2576 = vmatpush3.msra.mxu1 %v445_v34  ;;  %2542 = vmatprep.subr.mxu0 %v428_v35  ;;  %v408_v58 = vld [vmem:[%s5158_s6 + $0x18] sm:$0xff]  ;;  %v407_v63 = vld [vmem:[%s5158_s6 + $0x10] sm:$0xff]  ;;  %v454_v3 = vld [vmem:[%s5158_s6 + $0x188] sm:$0xff] }
  0x24   :  { %2577 = vmatprep.subr.mxu1 %v460_v36  ;;  %2543 = vmatpush3.msra.mxu0 %v412_v37  ;;  %v440_v59 = vld [vmem:[%s5158_s6 + $0x118] sm:$0xff]  ;;  %v439_v0 = vld [vmem:[%s5158_s6 + $0x110] sm:$0xff]  ;;  %v484_v1 = vrot.slane %v470_v57, %v3469_v51  ;;  %v406_v4 = vld [vmem:[%s5158_s6 + $0x8] sm:$0xff]  ;;  %v485_v8 = vcombine.high %v477_v62, %v477_v62 }
  0x25   :  { %2578 = vmatpush3.msra.mxu1 %v444_v38  ;;  %2544 = vmatprep.subr.mxu0 %v427_v39  ;;  %v438_v5 = vld [vmem:[%s5158_s6 + $0x108] sm:$0xff]  ;;  %v421_v6 = vld [vmem:[%s5158_s6 + $0x80] sm:$0xff]  ;;  %v115_v12 = vld [vmem:[%s5160_s8 + $0xf8] sm:$0xff] }
  0x26   :  { %2579 = vmatprep.subr.mxu1 %v459_v40  ;;  %2545 = vmatpush3.msra.mxu0 %v411_v43  ;;  %v453_v7 = vld [vmem:[%s5158_s6 + $0x180] sm:$0xff]  ;;  %v486_v10 = vcombine.high %v484_v1, %v484_v1  ;;  %v147_v13 = vld [vmem:[%s5160_s8 + $0x1f8] sm:$0xff]  ;;  %v114_v16 = vld [vmem:[%s5160_s8 + $0xf0] sm:$0xff] }
  0x27   :  { %2580 = vmatpush3.msra.mxu1 %v443_v44  ;;  %2546 = vmatprep.subr.mxu0 %v426_v45  ;;  %v405_v9 = vld [vmem:[%s5158_s6] sm:$0xff]  ;;  %v99_v14 = vld [vmem:[%s5160_s8 + $0x78] sm:$0xff]  ;;  %v146_v17 = vld [vmem:[%s5160_s8 + $0x1f0] sm:$0xff] }
  0x28   :  { %2581 = vmatprep.subr.mxu1 %v458_v46  ;;  %2547 = vmatpush3.msra.mxu0 %v410_v47  ;;  %v437_v11 = vld [vmem:[%s5158_s6 + $0x100] sm:$0xff]  ;;  %v131_v15 = vld [vmem:[%s5160_s8 + $0x178] sm:$0xff]  ;;  %v98_v18 = vld [vmem:[%s5160_s8 + $0x70] sm:$0xff] }
  0x29   :  { %2582 = vmatpush3.msra.mxu1 %v442_v48  ;;  %2548 = vmatprep.subr.mxu0 %v425_v49  ;;  %v130_v19 = vld [vmem:[%s5160_s8 + $0x170] sm:$0xff]  ;;  %v113_v20 = vld [vmem:[%s5160_s8 + $0xe8] sm:$0xff]  ;;  %v112_v24 = vld [vmem:[%s5160_s8 + $0xe0] sm:$0xff] }
  0x2a   :  { %2583 = vmatprep.subr.mxu1 %v457_v50  ;;  %2549 = vmatpush3.msra.mxu0 %v409_v52  ;;  %v145_v21 = vld [vmem:[%s5160_s8 + $0x1e8] sm:$0xff]  ;;  %v144_v25 = vld [vmem:[%s5160_s8 + $0x1e0] sm:$0xff]  ;;  %v111_v28 = vld [vmem:[%s5160_s8 + $0xd8] sm:$0xff] }
  0x2b   :  { %2584 = vmatpush3.msra.mxu1 %v441_v53  ;;  %2550 = vmatprep.subr.mxu0 %v424_v55  ;;  %v97_v22 = vld [vmem:[%s5160_s8 + $0x68] sm:$0xff]  ;;  %v96_v26 = vld [vmem:[%s5160_s8 + $0x60] sm:$0xff]  ;;  %v143_v29 = vld [vmem:[%s5160_s8 + $0x1d8] sm:$0xff] }
  0x2c   :  { %2585 = vmatprep.subr.mxu1 %v456_v56  ;;  %2551 = vmatpush3.msra.mxu0 %v408_v58  ;;  %v129_v23 = vld [vmem:[%s5160_s8 + $0x168] sm:$0xff]  ;;  %v128_v27 = vld [vmem:[%s5160_s8 + $0x160] sm:$0xff]  ;;  %v95_v30 = vld [vmem:[%s5160_s8 + $0x58] sm:$0xff] }
  0x2d   :  { %2586 = vmatpush3.msra.mxu1 %v440_v59  ;;  %2552 = vmatprep.subr.mxu0 %v423_v60  ;;  %v127_v31 = vld [vmem:[%s5160_s8 + $0x158] sm:$0xff]  ;;  %v110_v32 = vld [vmem:[%s5160_s8 + $0xd0] sm:$0xff]  ;;  %v109_v36 = vld [vmem:[%s5160_s8 + $0xc8] sm:$0xff] }
  0x2e   :  { %2587 = vmatprep.subr.mxu1 %v455_v61  ;;  %2553 = vmatpush3.msra.mxu0 %v407_v63  ;;  %v142_v33 = vld [vmem:[%s5160_s8 + $0x1d0] sm:$0xff]  ;;  %v141_v37 = vld [vmem:[%s5160_s8 + $0x1c8] sm:$0xff]  ;;  %v108_v40 = vld [vmem:[%s5160_s8 + $0xc0] sm:$0xff] }
  0x2f   :  { %2588 = vmatpush3.msra.mxu1 %v439_v0  ;;  %2554 = vmatprep.subr.mxu0 %v422_v2  ;;  %v94_v34 = vld [vmem:[%s5160_s8 + $0x50] sm:$0xff]  ;;  %v93_v38 = vld [vmem:[%s5160_s8 + $0x48] sm:$0xff]  ;;  %v140_v41 = vld [vmem:[%s5160_s8 + $0x1c0] sm:$0xff] }
  0x30   :  { %2589 = vmatprep.subr.mxu1 %v454_v3  ;;  %2555 = vmatpush3.msra.mxu0 %v406_v4  ;;  %v126_v35 = vld [vmem:[%s5160_s8 + $0x150] sm:$0xff]  ;;  %v125_v39 = vld [vmem:[%s5160_s8 + $0x148] sm:$0xff]  ;;  %v92_v43 = vld [vmem:[%s5160_s8 + $0x40] sm:$0xff] }
  0x31   :  { %2590 = vmatpush3.msra.mxu1 %v438_v5  ;;  %2556 = vmatprep.subr.mxu0 %v421_v6  ;;  %v124_v44 = vld [vmem:[%s5160_s8 + $0x140] sm:$0xff]  ;;  %v107_v45 = vld [vmem:[%s5160_s8 + $0xb8] sm:$0xff]  ;;  %v106_v49 = vld [vmem:[%s5160_s8 + $0xb0] sm:$0xff] }
  0x32   :  { %2591 = vmatprep.subr.mxu1 %v453_v7  ;;  %2557 = vmatpush3.msra.mxu0 %v405_v9  ;;  %v139_v46 = vld [vmem:[%s5160_s8 + $0x1b8] sm:$0xff]  ;;  %v138_v50 = vld [vmem:[%s5160_s8 + $0x1b0] sm:$0xff]  ;;  %v105_v54 = vld [vmem:[%s5160_s8 + $0xa8] sm:$0xff] }
  0x33   :  { %555 = vmatprep.mubr.f32.mxu0 %v485_v8  ;;  %2592 = vmatpush3.msra.mxu1 %v437_v11  ;;  %v91_v47 = vld [vmem:[%s5160_s8 + $0x38] sm:$0xff]  ;;  %v90_v52 = vld [vmem:[%s5160_s8 + $0x30] sm:$0xff]  ;;  %v137_v55 = vld [vmem:[%s5160_s8 + $0x1a8] sm:$0xff] }
  0x34   :  { %625 = vmatprep.mubr.f32.mxu1 %v486_v10  ;;  %556 = vmatmul.mubr.f32.vlgmr.msra.gmra.mxu0 %v477_v62  ;;  %v123_v48 = vld [vmem:[%s5160_s8 + $0x138] sm:$0xff]  ;;  %v122_v53 = vld [vmem:[%s5160_s8 + $0x130] sm:$0xff]  ;;  %v89_v56 = vld [vmem:[%s5160_s8 + $0x28] sm:$0xff] }
  0x35   :  { %626 = vmatmul.mubr.f32.vlgmr.msra.gmra.mxu1 %v484_v1  ;;  %2596 = vmatprep.subr.mxu0 %v115_v12  ;;  %v121_v57 = vld [vmem:[%s5160_s8 + $0x128] sm:$0xff]  ;;  %v79_v58 = vld [vmem:[%s5161_s5] sm:$0xff]  ;;  %v103_v63 = vld [vmem:[%s5160_s8 + $0x98] sm:$0xff] }
  0x36   :  { %2631 = vmatprep.subr.mxu1 %v147_v13  ;;  %2597 = vmatpush3.msra.mxu0 %v99_v14  ;;  %v104_v59 = vld [vmem:[%s5160_s8 + $0xa0] sm:$0xff]  ;;  %v135_v0 = vld [vmem:[%s5160_s8 + $0x198] sm:$0xff]  ;;  %v636_v1 = vcombine.high %v79_v58, %v79_v58  ;;  %v102_v4 = vld [vmem:[%s5160_s8 + $0x90] sm:$0xff]  ;;  %v643_v6 = vrot.slane %v79_v58, %v3469_v51 }
  0x37   :  { %2632 = vmatpush3.msra.mxu1 %v131_v15  ;;  %2598 = vmatprep.subr.mxu0 %v114_v16  ;;  %v136_v60 = vld [vmem:[%s5160_s8 + $0x1a0] sm:$0xff]  ;;  %v87_v2 = vld [vmem:[%s5160_s8 + $0x18] sm:$0xff]  ;;  %v134_v5 = vld [vmem:[%s5160_s8 + $0x190] sm:$0xff] }
  0x38   :  { %2633 = vmatprep.subr.mxu1 %v146_v17  ;;  %2599 = vmatpush3.msra.mxu0 %v98_v18  ;;  %v88_v61 = vld [vmem:[%s5160_s8 + $0x20] sm:$0xff]  ;;  %v119_v3 = vld [vmem:[%s5160_s8 + $0x118] sm:$0xff]  ;;  %v86_v7 = vld [vmem:[%s5160_s8 + $0x10] sm:$0xff]  ;;  %v650_v11 = vrot.slane %v636_v1, %v3469_v51  ;;  %v651_v16 = vcombine.high %v643_v6, %v643_v6 }
  0x39   :  { %2634 = vmatpush3.msra.mxu1 %v130_v19  ;;  %2600 = vmatprep.subr.mxu0 %v113_v20  ;;  %v120_v62 = vld [vmem:[%s5160_s8 + $0x120] sm:$0xff]  ;;  %v118_v8 = vld [vmem:[%s5160_s8 + $0x110] sm:$0xff]  ;;  %v101_v9 = vld [vmem:[%s5160_s8 + $0x88] sm:$0xff] }
  0x3a   :  { %2635 = vmatprep.subr.mxu1 %v145_v21  ;;  %2601 = vmatpush3.msra.mxu0 %v97_v22  ;;  %v133_v10 = vld [vmem:[%s5160_s8 + $0x188] sm:$0xff]  ;;  %v100_v14 = vld [vmem:[%s5160_s8 + $0x80] sm:$0xff]  ;;  %v652_v19 = vcombine.high %v650_v11, %v650_v11  ;;  %v179_v20 = vld [vmem:[%s5160_s8 + $0x2f8] sm:$0xff] }
  0x3b   :  { %2636 = vmatpush3.msra.mxu1 %v129_v23  ;;  %2602 = vmatprep.subr.mxu0 %v112_v24  ;;  %v85_v12 = vld [vmem:[%s5160_s8 + $0x8] sm:$0xff]  ;;  %v132_v15 = vld [vmem:[%s5160_s8 + $0x180] sm:$0xff]  ;;  %v211_v21 = vld [vmem:[%s5160_s8 + $0x3f8] sm:$0xff] }
  0x3c   :  { %2637 = vmatprep.subr.mxu1 %v144_v25  ;;  %2603 = vmatpush3.msra.mxu0 %v96_v26  ;;  %v117_v13 = vld [vmem:[%s5160_s8 + $0x108] sm:$0xff]  ;;  %v84_v17 = vld [vmem:[%s5160_s8] sm:$0xff]  ;;  %v163_v22 = vld [vmem:[%s5160_s8 + $0x278] sm:$0xff] }
  0x3d   :  { %2638 = vmatpush3.msra.mxu1 %v128_v27  ;;  %2604 = vmatprep.subr.mxu0 %v111_v28  ;;  %v116_v18 = vld [vmem:[%s5160_s8 + $0x100] sm:$0xff]  ;;  %v195_v23 = vld [vmem:[%s5160_s8 + $0x378] sm:$0xff]  ;;  %v178_v24 = vld [vmem:[%s5160_s8 + $0x2f0] sm:$0xff] }
  0x3e   :  { %2639 = vmatprep.subr.mxu1 %v143_v29  ;;  %2605 = vmatpush3.msra.mxu0 %v95_v30  ;;  %v210_v25 = vld [vmem:[%s5160_s8 + $0x3f0] sm:$0xff]  ;;  %v177_v28 = vld [vmem:[%s5160_s8 + $0x2e8] sm:$0xff] }
  0x3f   :  { %2640 = vmatpush3.msra.mxu1 %v127_v31  ;;  %2606 = vmatprep.subr.mxu0 %v110_v32  ;;  %v162_v26 = vld [vmem:[%s5160_s8 + $0x270] sm:$0xff]  ;;  %v209_v29 = vld [vmem:[%s5160_s8 + $0x3e8] sm:$0xff]  ;;  %v176_v32 = vld [vmem:[%s5160_s8 + $0x2e0] sm:$0xff] }
  0x40   :  { %2641 = vmatprep.subr.mxu1 %v142_v33  ;;  %2607 = vmatpush3.msra.mxu0 %v94_v34  ;;  %v194_v27 = vld [vmem:[%s5160_s8 + $0x370] sm:$0xff]  ;;  %v161_v30 = vld [vmem:[%s5160_s8 + $0x268] sm:$0xff]  ;;  %v208_v33 = vld [vmem:[%s5160_s8 + $0x3e0] sm:$0xff] }
  0x41   :  { %2642 = vmatpush3.msra.mxu1 %v126_v35  ;;  %2608 = vmatprep.subr.mxu0 %v109_v36  ;;  %v193_v31 = vld [vmem:[%s5160_s8 + $0x368] sm:$0xff]  ;;  %v160_v34 = vld [vmem:[%s5160_s8 + $0x260] sm:$0xff]  ;;  %v175_v36 = vld [vmem:[%s5160_s8 + $0x2d8] sm:$0xff] }
  0x42   :  { %2643 = vmatprep.subr.mxu1 %v141_v37  ;;  %2609 = vmatpush3.msra.mxu0 %v93_v38  ;;  %v192_v35 = vld [vmem:[%s5160_s8 + $0x360] sm:$0xff]  ;;  %v207_v37 = vld [vmem:[%s5160_s8 + $0x3d8] sm:$0xff]  ;;  %v170_v58 = vld [vmem:[%s5160_s8 + $0x2b0] sm:$0xff] }
  0x43   :  { %2644 = vmatpush3.msra.mxu1 %v125_v39  ;;  %2610 = vmatprep.subr.mxu0 %v108_v40  ;;  %v159_v38 = vld [vmem:[%s5160_s8 + $0x258] sm:$0xff]  ;;  %v174_v40 = vld [vmem:[%s5160_s8 + $0x2d0] sm:$0xff]  ;;  %v185_v1 = vld [vmem:[%s5160_s8 + $0x328] sm:$0xff] }
  0x44   :  { %2645 = vmatprep.subr.mxu1 %v140_v41  ;;  %2611 = vmatpush3.msra.mxu0 %v92_v43  ;;  %v191_v39 = vld [vmem:[%s5160_s8 + $0x358] sm:$0xff]  ;;  %v206_v41 = vld [vmem:[%s5160_s8 + $0x3d0] sm:$0xff] }
  0x45   :  { %2646 = vmatpush3.msra.mxu1 %v124_v44  ;;  %2612 = vmatprep.subr.mxu0 %v107_v45  ;;  %v158_v43 = vld [vmem:[%s5160_s8 + $0x250] sm:$0xff]  ;;  %v173_v45 = vld [vmem:[%s5160_s8 + $0x2c8] sm:$0xff] }
  0x46   :  { %2647 = vmatprep.subr.mxu1 %v139_v46  ;;  %2613 = vmatpush3.msra.mxu0 %v91_v47  ;;  %v190_v44 = vld [vmem:[%s5160_s8 + $0x350] sm:$0xff]  ;;  %v205_v46 = vld [vmem:[%s5160_s8 + $0x3c8] sm:$0xff] }
  0x47   :  { %2648 = vmatpush3.msra.mxu1 %v123_v48  ;;  %2614 = vmatprep.subr.mxu0 %v106_v49  ;;  %v157_v47 = vld [vmem:[%s5160_s8 + $0x248] sm:$0xff]  ;;  %v172_v49 = vld [vmem:[%s5160_s8 + $0x2c0] sm:$0xff] }
  0x48   :  { %2649 = vmatprep.subr.mxu1 %v138_v50  ;;  %2615 = vmatpush3.msra.mxu0 %v90_v52  ;;  %v189_v48 = vld [vmem:[%s5160_s8 + $0x348] sm:$0xff]  ;;  %v204_v50 = vld [vmem:[%s5160_s8 + $0x3c0] sm:$0xff] }
  0x49   :  { %2650 = vmatpush3.msra.mxu1 %v122_v53  ;;  %2616 = vmatprep.subr.mxu0 %v105_v54  ;;  %v156_v52 = vld [vmem:[%s5160_s8 + $0x240] sm:$0xff]  ;;  %v171_v54 = vld [vmem:[%s5160_s8 + $0x2b8] sm:$0xff] }
  0x4a   :  { %2651 = vmatprep.subr.mxu1 %v137_v55  ;;  %2617 = vmatpush3.msra.mxu0 %v89_v56  ;;  %v188_v53 = vld [vmem:[%s5160_s8 + $0x340] sm:$0xff]  ;;  %v203_v55 = vld [vmem:[%s5160_s8 + $0x3b8] sm:$0xff] }
  0x4b   :  { %2652 = vmatpush3.msra.mxu1 %v121_v57  ;;  %2618 = vmatprep.subr.mxu0 %v104_v59  ;;  %v155_v56 = vld [vmem:[%s5160_s8 + $0x238] sm:$0xff]  ;;  %v202_v59 = vld [vmem:[%s5160_s8 + $0x3b0] sm:$0xff] }
  0x4c   :  { %2653 = vmatprep.subr.mxu1 %v136_v60  ;;  %2619 = vmatpush3.msra.mxu0 %v88_v61  ;;  %v187_v57 = vld [vmem:[%s5160_s8 + $0x338] sm:$0xff]  ;;  %v154_v60 = vld [vmem:[%s5160_s8 + $0x230] sm:$0xff] }
  0x4d   :  { %2654 = vmatpush3.msra.mxu1 %v120_v62  ;;  %2620 = vmatprep.subr.mxu0 %v103_v63  ;;  %v186_v61 = vld [vmem:[%s5160_s8 + $0x330] sm:$0xff]  ;;  %v169_v62 = vld [vmem:[%s5160_s8 + $0x2a8] sm:$0xff] }
  0x4e   :  { %2655 = vmatprep.subr.mxu1 %v135_v0  ;;  %2621 = vmatpush3.msra.mxu0 %v87_v2  ;;  %v201_v63 = vld [vmem:[%s5160_s8 + $0x3a8] sm:$0xff] }
  0x4f   :  { %2656 = vmatpush3.msra.mxu1 %v119_v3  ;;  %2622 = vmatprep.subr.mxu0 %v102_v4  ;;  %v153_v0 = vld [vmem:[%s5160_s8 + $0x228] sm:$0xff]  ;;  %v168_v3 = vld [vmem:[%s5160_s8 + $0x2a0] sm:$0xff] }
  0x50   :  { %2657 = vmatprep.subr.mxu1 %v134_v5  ;;  %2623 = vmatpush3.msra.mxu0 %v86_v7  ;;  %v80_v2 = vld [vmem:[%s5161_s5 + $0x8] sm:$0xff]  ;;  %v200_v4 = vld [vmem:[%s5160_s8 + $0x3a0] sm:$0xff]  ;;  %v167_v7 = vld [vmem:[%s5160_s8 + $0x298] sm:$0xff] }
  0x51   :  { %2658 = vmatpush3.msra.mxu1 %v118_v8  ;;  %2624 = vmatprep.subr.mxu0 %v101_v9  ;;  %v152_v5 = vld [vmem:[%s5160_s8 + $0x220] sm:$0xff]  ;;  %v199_v8 = vld [vmem:[%s5160_s8 + $0x398] sm:$0xff]  ;;  %v653_v9 = vcombine.high %v80_v2, %v80_v2 }
  0x52   :  { %2659 = vmatprep.subr.mxu1 %v133_v10  ;;  %2625 = vmatpush3.msra.mxu0 %v85_v12  ;;  %v151_v10 = vld [vmem:[%s5160_s8 + $0x218] sm:$0xff]  ;;  %v166_v12 = vld [vmem:[%s5160_s8 + $0x290] sm:$0xff] }
  0x53   :  { %2660 = vmatpush3.msra.mxu1 %v117_v13  ;;  %2626 = vmatprep.subr.mxu0 %v100_v14  ;;  %v198_v13 = vld [vmem:[%s5160_s8 + $0x390] sm:$0xff]  ;;  %v660_v14 = vrot.slane %v80_v2, %v3469_v51 }
  0x54   :  { %2661 = vmatprep.subr.mxu1 %v132_v15  ;;  %2627 = vmatpush3.msra.mxu0 %v84_v17  ;;  %v150_v15 = vld [vmem:[%s5160_s8 + $0x210] sm:$0xff]  ;;  %v165_v17 = vld [vmem:[%s5160_s8 + $0x288] sm:$0xff] }
  0x55   :  { %805 = vmatprep.mubr.f32.mxu0 %v651_v16  ;;  %2662 = vmatpush3.msra.mxu1 %v116_v18  ;;  %v182_v16 = vld [vmem:[%s5160_s8 + $0x310] sm:$0xff]  ;;  %v197_v18 = vld [vmem:[%s5160_s8 + $0x388] sm:$0xff] }
  0x56   :  { %806 = vmatmul.mubr.f32.vlgmr.msra.gmra.mxu0 %v643_v6  ;;  %875 = vmatprep.mubr.f32.mxu1 %v652_v19  ;;  %v184_v6 = vld [vmem:[%s5160_s8 + $0x320] sm:$0xff]  ;;  %v667_v19 = vrot.slane %v653_v9, %v3469_v51  ;;  %v234_v2 = vld [vmem:[%s5160_s8 + $0x4b0] sm:$0xff]  ;;  %v249_v9 = vld [vmem:[%s5160_s8 + $0x528] sm:$0xff] }
  0x57   :  { %2666 = vmatprep.subr.mxu0 %v179_v20  ;;  %2701 = vmatprep.subr.mxu1 %v211_v21  ;;  %v149_v20 = vld [vmem:[%s5160_s8 + $0x208] sm:$0xff] }
  0x58   :  { %876 = vmatmul.mubr.f32.vlgmr.msra.gmra.mxu1 %v650_v11  ;;  %2667 = vmatpush3.msra.mxu0 %v163_v22  ;;  %v183_v11 = vld [vmem:[%s5160_s8 + $0x318] sm:$0xff]  ;;  %v181_v21 = vld [vmem:[%s5160_s8 + $0x308] sm:$0xff]  ;;  %v164_v22 = vld [vmem:[%s5160_s8 + $0x280] sm:$0xff] }
  0x59   :  { %2702 = vmatpush3.msra.mxu1 %v195_v23  ;;  %2668 = vmatprep.subr.mxu0 %v178_v24  ;;  %v196_v23 = vld [vmem:[%s5160_s8 + $0x380] sm:$0xff]  ;;  %v668_v24 = vcombine.high %v660_v14, %v660_v14 }
  0x5a   :  { %2703 = vmatprep.subr.mxu1 %v210_v25  ;;  %2669 = vmatpush3.msra.mxu0 %v162_v26  ;;  %v148_v25 = vld [vmem:[%s5160_s8 + $0x200] sm:$0xff] }
  0x5b   :  { %2704 = vmatpush3.msra.mxu1 %v194_v27  ;;  %2670 = vmatprep.subr.mxu0 %v177_v28  ;;  %v180_v26 = vld [vmem:[%s5160_s8 + $0x300] sm:$0xff]  ;;  %v669_v27 = vcombine.high %v667_v19, %v667_v19  ;;  %v243_v28 = vld [vmem:[%s5160_s8 + $0x4f8] sm:$0xff] }
  0x5c   :  { %2705 = vmatprep.subr.mxu1 %v209_v29  ;;  %2671 = vmatpush3.msra.mxu0 %v161_v30  ;;  %v275_v29 = vld [vmem:[%s5160_s8 + $0x5f8] sm:$0xff] }
  0x5d   :  { %2706 = vmatpush3.msra.mxu1 %v193_v31  ;;  %2672 = vmatprep.subr.mxu0 %v176_v32  ;;  %v227_v30 = vld [vmem:[%s5160_s8 + $0x478] sm:$0xff]  ;;  %v242_v32 = vld [vmem:[%s5160_s8 + $0x4f0] sm:$0xff] }
  0x5e   :  { %2707 = vmatprep.subr.mxu1 %v208_v33  ;;  %2673 = vmatpush3.msra.mxu0 %v160_v34  ;;  %v259_v31 = vld [vmem:[%s5160_s8 + $0x578] sm:$0xff]  ;;  %v274_v33 = vld [vmem:[%s5160_s8 + $0x5f0] sm:$0xff] }
  0x5f   :  { %2708 = vmatpush3.msra.mxu1 %v192_v35  ;;  %2674 = vmatprep.subr.mxu0 %v175_v36  ;;  %v226_v34 = vld [vmem:[%s5160_s8 + $0x470] sm:$0xff]  ;;  %v241_v36 = vld [vmem:[%s5160_s8 + $0x4e8] sm:$0xff] }
  0x60   :  { %2709 = vmatprep.subr.mxu1 %v207_v37  ;;  %2675 = vmatpush3.msra.mxu0 %v159_v38  ;;  %v258_v35 = vld [vmem:[%s5160_s8 + $0x570] sm:$0xff]  ;;  %v273_v37 = vld [vmem:[%s5160_s8 + $0x5e8] sm:$0xff] }
  0x61   :  { %2710 = vmatpush3.msra.mxu1 %v191_v39  ;;  %2676 = vmatprep.subr.mxu0 %v174_v40  ;;  %v225_v38 = vld [vmem:[%s5160_s8 + $0x468] sm:$0xff]  ;;  %v240_v40 = vld [vmem:[%s5160_s8 + $0x4e0] sm:$0xff] }
  0x62   :  { %2711 = vmatprep.subr.mxu1 %v206_v41  ;;  %2677 = vmatpush3.msra.mxu0 %v158_v43  ;;  %v257_v39 = vld [vmem:[%s5160_s8 + $0x568] sm:$0xff]  ;;  %v272_v41 = vld [vmem:[%s5160_s8 + $0x5e0] sm:$0xff] }
  0x63   :  { %2712 = vmatpush3.msra.mxu1 %v190_v44  ;;  %2678 = vmatprep.subr.mxu0 %v173_v45  ;;  %v224_v43 = vld [vmem:[%s5160_s8 + $0x460] sm:$0xff]  ;;  %v239_v45 = vld [vmem:[%s5160_s8 + $0x4d8] sm:$0xff] }
  0x64   :  { %2713 = vmatprep.subr.mxu1 %v205_v46  ;;  %2679 = vmatpush3.msra.mxu0 %v157_v47  ;;  %v256_v44 = vld [vmem:[%s5160_s8 + $0x560] sm:$0xff]  ;;  %v271_v46 = vld [vmem:[%s5160_s8 + $0x5d8] sm:$0xff] }
  0x65   :  { %2714 = vmatpush3.msra.mxu1 %v189_v48  ;;  %2680 = vmatprep.subr.mxu0 %v172_v49  ;;  %v223_v47 = vld [vmem:[%s5160_s8 + $0x458] sm:$0xff]  ;;  %v238_v49 = vld [vmem:[%s5160_s8 + $0x4d0] sm:$0xff] }
  0x66   :  { %2715 = vmatprep.subr.mxu1 %v204_v50  ;;  %2681 = vmatpush3.msra.mxu0 %v156_v52  ;;  %v255_v48 = vld [vmem:[%s5160_s8 + $0x558] sm:$0xff]  ;;  %v270_v50 = vld [vmem:[%s5160_s8 + $0x5d0] sm:$0xff] }
  0x67   :  { %2716 = vmatpush3.msra.mxu1 %v188_v53  ;;  %2682 = vmatprep.subr.mxu0 %v171_v54  ;;  %v222_v52 = vld [vmem:[%s5160_s8 + $0x450] sm:$0xff]  ;;  %v237_v54 = vld [vmem:[%s5160_s8 + $0x4c8] sm:$0xff] }
  0x68   :  { %2717 = vmatprep.subr.mxu1 %v203_v55  ;;  %2683 = vmatpush3.msra.mxu0 %v155_v56  ;;  %v254_v53 = vld [vmem:[%s5160_s8 + $0x550] sm:$0xff]  ;;  %v269_v55 = vld [vmem:[%s5160_s8 + $0x5c8] sm:$0xff] }
  0x69   :  { %2718 = vmatpush3.msra.mxu1 %v187_v57  ;;  %2684 = vmatprep.subr.mxu0 %v170_v58  ;;  %v221_v56 = vld [vmem:[%s5160_s8 + $0x448] sm:$0xff]  ;;  %v236_v58 = vld [vmem:[%s5160_s8 + $0x4c0] sm:$0xff] }
  0x6a   :  { %2719 = vmatprep.subr.mxu1 %v202_v59  ;;  %2685 = vmatpush3.msra.mxu0 %v154_v60  ;;  %v253_v57 = vld [vmem:[%s5160_s8 + $0x548] sm:$0xff]  ;;  %v268_v59 = vld [vmem:[%s5160_s8 + $0x5c0] sm:$0xff] }
  0x6b   :  { %2720 = vmatpush3.msra.mxu1 %v186_v61  ;;  %2686 = vmatprep.subr.mxu0 %v169_v62  ;;  %v220_v60 = vld [vmem:[%s5160_s8 + $0x440] sm:$0xff]  ;;  %v235_v62 = vld [vmem:[%s5160_s8 + $0x4b8] sm:$0xff] }
  0x6c   :  { %2721 = vmatprep.subr.mxu1 %v201_v63  ;;  %2687 = vmatpush3.msra.mxu0 %v153_v0  ;;  %v252_v61 = vld [vmem:[%s5160_s8 + $0x540] sm:$0xff]  ;;  %v267_v63 = vld [vmem:[%s5160_s8 + $0x5b8] sm:$0xff] }
  0x6d   :  { %2722 = vmatpush3.msra.mxu1 %v185_v1  ;;  %2688 = vmatprep.subr.mxu0 %v168_v3  ;;  %v219_v0 = vld [vmem:[%s5160_s8 + $0x438] sm:$0xff]  ;;  %v266_v3 = vld [vmem:[%s5160_s8 + $0x5b0] sm:$0xff] }
  0x6e   :  { %2723 = vmatprep.subr.mxu1 %v200_v4  ;;  %2689 = vmatpush3.msra.mxu0 %v152_v5  ;;  %v251_v1 = vld [vmem:[%s5160_s8 + $0x538] sm:$0xff]  ;;  %v218_v4 = vld [vmem:[%s5160_s8 + $0x430] sm:$0xff] }
  0x6f   :  { %2724 = vmatpush3.msra.mxu1 %v184_v6  ;;  %2690 = vmatprep.subr.mxu0 %v167_v7  ;;  %v250_v5 = vld [vmem:[%s5160_s8 + $0x530] sm:$0xff]  ;;  %v233_v6 = vld [vmem:[%s5160_s8 + $0x4a8] sm:$0xff] }
  0x70   :  { %2725 = vmatprep.subr.mxu1 %v199_v8  ;;  %2691 = vmatpush3.msra.mxu0 %v151_v10  ;;  %v265_v7 = vld [vmem:[%s5160_s8 + $0x5a8] sm:$0xff]  ;;  %v81_v10 = vld [vmem:[%s5161_s5 + $0x10] sm:$0xff] }
  0x71   :  { %2726 = vmatpush3.msra.mxu1 %v183_v11  ;;  %2692 = vmatprep.subr.mxu0 %v166_v12  ;;  %v217_v8 = vld [vmem:[%s5160_s8 + $0x428] sm:$0xff]  ;;  %v232_v11 = vld [vmem:[%s5160_s8 + $0x4a0] sm:$0xff] }
  0x72   :  { %2727 = vmatprep.subr.mxu1 %v198_v13  ;;  %2693 = vmatpush3.msra.mxu0 %v150_v15  ;;  %v264_v12 = vld [vmem:[%s5160_s8 + $0x5a0] sm:$0xff]  ;;  %v231_v15 = vld [vmem:[%s5160_s8 + $0x498] sm:$0xff] }
  0x73   :  { %2728 = vmatpush3.msra.mxu1 %v182_v16  ;;  %2694 = vmatprep.subr.mxu0 %v165_v17  ;;  %v216_v13 = vld [vmem:[%s5160_s8 + $0x420] sm:$0xff]  ;;  %v263_v16 = vld [vmem:[%s5160_s8 + $0x598] sm:$0xff]  ;;  %v670_v17 = vcombine.high %v81_v10, %v81_v10 }
  0x74   :  { %2729 = vmatprep.subr.mxu1 %v197_v18  ;;  %2695 = vmatpush3.msra.mxu0 %v149_v20  ;;  %v215_v18 = vld [vmem:[%s5160_s8 + $0x418] sm:$0xff]  ;;  %v230_v20 = vld [vmem:[%s5160_s8 + $0x490] sm:$0xff] }
  0x75   :  { %2730 = vmatpush3.msra.mxu1 %v181_v21  ;;  %2696 = vmatprep.subr.mxu0 %v164_v22  ;;  %v262_v21 = vld [vmem:[%s5160_s8 + $0x590] sm:$0xff]  ;;  %v677_v22 = vrot.slane %v81_v10, %v3469_v51 }
  0x76   :  { %2731 = vmatprep.subr.mxu1 %v196_v23  ;;  %2697 = vmatpush3.msra.mxu0 %v148_v25  ;;  %v214_v23 = vld [vmem:[%s5160_s8 + $0x410] sm:$0xff]  ;;  %v229_v25 = vld [vmem:[%s5160_s8 + $0x488] sm:$0xff] }
  0x77   :  { %945 = vmatprep.mubr.f32.mxu0 %v668_v24  ;;  %2732 = vmatpush3.msra.mxu1 %v180_v26  ;;  %v246_v24 = vld [vmem:[%s5160_s8 + $0x510] sm:$0xff]  ;;  %v261_v26 = vld [vmem:[%s5160_s8 + $0x588] sm:$0xff] }
  0x78   :  { %946 = vmatmul.mubr.f32.vlgmr.msra.gmra.mxu0 %v660_v14  ;;  %1015 = vmatprep.mubr.f32.mxu1 %v669_v27  ;;  %v248_v14 = vld [vmem:[%s5160_s8 + $0x520] sm:$0xff]  ;;  %v684_v27 = vrot.slane %v670_v17, %v3469_v51 }
  0x79   :  { %2736 = vmatprep.subr.mxu0 %v243_v28  ;;  %2771 = vmatprep.subr.mxu1 %v275_v29  ;;  %v213_v28 = vld [vmem:[%s5160_s8 + $0x408] sm:$0xff] }
  0x7a   :  { %1016 = vmatmul.mubr.f32.vlgmr.msra.gmra.mxu1 %v667_v19  ;;  %2737 = vmatpush3.msra.mxu0 %v227_v30  ;;  %v247_v19 = vld [vmem:[%s5160_s8 + $0x518] sm:$0xff]  ;;  %v245_v29 = vld [vmem:[%s5160_s8 + $0x508] sm:$0xff]  ;;  %v228_v30 = vld [vmem:[%s5160_s8 + $0x480] sm:$0xff] }
  0x7b   :  { %2772 = vmatpush3.msra.mxu1 %v259_v31  ;;  %2738 = vmatprep.subr.mxu0 %v242_v32  ;;  %v260_v31 = vld [vmem:[%s5160_s8 + $0x580] sm:$0xff]  ;;  %v685_v32 = vcombine.high %v677_v22, %v677_v22 }
  0x7c   :  { %2773 = vmatprep.subr.mxu1 %v274_v33  ;;  %2739 = vmatpush3.msra.mxu0 %v226_v34 }
  0x7d   :  { %2774 = vmatpush3.msra.mxu1 %v258_v35  ;;  %2740 = vmatprep.subr.mxu0 %v241_v36 }
  0x7e   :  { %2775 = vmatprep.subr.mxu1 %v273_v37  ;;  %2741 = vmatpush3.msra.mxu0 %v225_v38 }
  0x7f   :  { %2776 = vmatpush3.msra.mxu1 %v257_v39  ;;  %2742 = vmatprep.subr.mxu0 %v240_v40 }
  0x80   :  { %2777 = vmatprep.subr.mxu1 %v272_v41  ;;  %2743 = vmatpush3.msra.mxu0 %v224_v43 }
  0x81   :  { %2778 = vmatpush3.msra.mxu1 %v256_v44  ;;  %2744 = vmatprep.subr.mxu0 %v239_v45 }
  0x82   :  { %2779 = vmatprep.subr.mxu1 %v271_v46  ;;  %2745 = vmatpush3.msra.mxu0 %v223_v47 }
  0x83   :  { %2780 = vmatpush3.msra.mxu1 %v255_v48  ;;  %2746 = vmatprep.subr.mxu0 %v238_v49 }
  0x84   :  { %2781 = vmatprep.subr.mxu1 %v270_v50  ;;  %2747 = vmatpush3.msra.mxu0 %v222_v52 }
  0x85   :  { %2782 = vmatpush3.msra.mxu1 %v254_v53  ;;  %2748 = vmatprep.subr.mxu0 %v237_v54 }
  0x86   :  { %2783 = vmatprep.subr.mxu1 %v269_v55  ;;  %2749 = vmatpush3.msra.mxu0 %v221_v56 }
  0x87   :  { %2784 = vmatpush3.msra.mxu1 %v253_v57  ;;  %2750 = vmatprep.subr.mxu0 %v236_v58 }
  0x88   :  { %2785 = vmatprep.subr.mxu1 %v268_v59  ;;  %2751 = vmatpush3.msra.mxu0 %v220_v60 }
  0x89   :  { %2786 = vmatpush3.msra.mxu1 %v252_v61  ;;  %2752 = vmatprep.subr.mxu0 %v235_v62 }
  0x8a   :  { %2787 = vmatprep.subr.mxu1 %v267_v63  ;;  %2753 = vmatpush3.msra.mxu0 %v219_v0 }
  0x8b   :  { %2788 = vmatpush3.msra.mxu1 %v251_v1  ;;  %2754 = vmatprep.subr.mxu0 %v234_v2 }
  0x8c   :  { %2789 = vmatprep.subr.mxu1 %v266_v3  ;;  %2755 = vmatpush3.msra.mxu0 %v218_v4 }
  0x8d   :  { %2790 = vmatpush3.msra.mxu1 %v250_v5  ;;  %2756 = vmatprep.subr.mxu0 %v233_v6 }
  0x8e   :  { %2791 = vmatprep.subr.mxu1 %v265_v7  ;;  %2757 = vmatpush3.msra.mxu0 %v217_v8 }
  0x8f   :  { %2792 = vmatpush3.msra.mxu1 %v249_v9  ;;  %2758 = vmatprep.subr.mxu0 %v232_v11 }
  0x90   :  { %2793 = vmatprep.subr.mxu1 %v264_v12  ;;  %2759 = vmatpush3.msra.mxu0 %v216_v13 }
  0x91   :  { %2794 = vmatpush3.msra.mxu1 %v248_v14  ;;  %2760 = vmatprep.subr.mxu0 %v231_v15 }
  0x92   :  { %2795 = vmatprep.subr.mxu1 %v263_v16  ;;  %2761 = vmatpush3.msra.mxu0 %v215_v18 }
  0x93   :  { %2796 = vmatpush3.msra.mxu1 %v247_v19  ;;  %2762 = vmatprep.subr.mxu0 %v230_v20 }
  0x94   :  { %2797 = vmatprep.subr.mxu1 %v262_v21  ;;  %2763 = vmatpush3.msra.mxu0 %v214_v23 }
  0x95   :  { %2798 = vmatpush3.msra.mxu1 %v246_v24 }
  0x96   :  { %32 = vsyncpa [#allocation5], 0  ;;  %2764 = vmatprep.subr.mxu0 %v229_v25  ;;  %2799 = vmatprep.subr.mxu1 %v261_v26  ;;  %v212_v33 = vld [vmem:[%s5160_s8 + $0x400] sm:$0xff]  ;;  %v686_v35 = vcombine.high %v684_v27, %v684_v27  ;;  %v307_v36 = vld [vmem:[%s5160_s8 + $0x6f8] sm:$0xff]  ;;  %s5162_s6 = sld [smem:[#allocation14_spill]]  ;;  %vm3195_vm0 = vmmov 0  }
  0x97   :  { %2765 = vmatpush3.msra.mxu0 %v213_v28  ;;  %2800 = vmatpush3.msra.mxu1 %v245_v29  ;;  %v244_v34 = vld [vmem:[%s5160_s8 + $0x500] sm:$0xff]  ;;  %v339_v37 = vld [vmem:[%s5160_s8 + $0x7f8] sm:$0xff]  ;;  %v306_v40 = vld [vmem:[%s5160_s8 + $0x6f0] sm:$0xff]  ;;  %s5163_s26 = sld [smem:[#allocation13_spill]]  ;;  %vm1467_vm1 = vcmask 261120   ;;  %vm2022_vm2 = vcmask 130048  }
  0x98   :  { %2766 = vmatprep.subr.mxu0 %v228_v30  ;;  %2801 = vmatprep.subr.mxu1 %v260_v31  ;;  %v291_v38 = vld [vmem:[%s5160_s8 + $0x678] sm:$0xff]  ;;  %v338_v41 = vld [vmem:[%s5160_s8 + $0x7f0] sm:$0xff]  ;;  %v305_v45 = vld [vmem:[%s5160_s8 + $0x6e8] sm:$0xff]  ;;  %s5164_s4 = sld [smem:[#allocation16_spill]]  ;;  %vm2472_vm3 = vcmask 123904  }
  0x99   :  { %2767 = vmatpush3.msra.mxu0 %v212_v33  ;;  %1085 = vmatprep.mubr.f32.mxu0 %v685_v32  ;;  %v323_v39 = vld [vmem:[%s5160_s8 + $0x778] sm:$0xff]  ;;  %v290_v43 = vld [vmem:[%s5160_s8 + $0x670] sm:$0xff]  ;;  %v337_v46 = vld [vmem:[%s5160_s8 + $0x7e8] sm:$0xff]  ;;  %s5165_s2 = sld [smem:[#allocation10_spill]] }
  0x9a   :  { %2802 = vmatpush3.msra.mxu1 %v244_v34  ;;  %1086 = vmatmul.mubr.f32.vlgmr.msra.gmra.mxu0 %v677_v22  ;;  %v322_v44 = vld [vmem:[%s5160_s8 + $0x770] sm:$0xff]  ;;  %v289_v47 = vld [vmem:[%s5160_s8 + $0x668] sm:$0xff]  ;;  %v304_v49 = vld [vmem:[%s5160_s8 + $0x6e0] sm:$0xff]  ;;  %s5166_s28 = sld [smem:[#allocation15_spill]] }
  0x9b   :  { %1155 = vmatprep.mubr.f32.mxu1 %v686_v35  ;;  %2806 = vmatprep.subr.mxu0 %v307_v36  ;;  %v321_v48 = vld [vmem:[%s5160_s8 + $0x768] sm:$0xff]  ;;  %v336_v50 = vld [vmem:[%s5160_s8 + $0x7e0] sm:$0xff]  ;;  %v303_v54 = vld [vmem:[%s5160_s8 + $0x6d8] sm:$0xff] }
  0x9c   :  { %2841 = vmatprep.subr.mxu1 %v339_v37  ;;  %1156 = vmatmul.mubr.f32.vlgmr.msra.gmra.mxu1 %v684_v27  ;;  %v288_v52 = vld [vmem:[%s5160_s8 + $0x660] sm:$0xff]  ;;  %v335_v55 = vld [vmem:[%s5160_s8 + $0x7d8] sm:$0xff]  ;;  %v302_v58 = vld [vmem:[%s5160_s8 + $0x6d0] sm:$0xff] }
  0x9d   :  { %2807 = vmatpush3.msra.mxu0 %v291_v38  ;;  %2842 = vmatpush3.msra.mxu1 %v323_v39  ;;  %v320_v53 = vld [vmem:[%s5160_s8 + $0x760] sm:$0xff]  ;;  %v287_v56 = vld [vmem:[%s5160_s8 + $0x658] sm:$0xff]  ;;  %v334_v59 = vld [vmem:[%s5160_s8 + $0x7d0] sm:$0xff] }
  0x9e   :  { %2808 = vmatprep.subr.mxu0 %v306_v40  ;;  %2843 = vmatprep.subr.mxu1 %v338_v41  ;;  %v319_v57 = vld [vmem:[%s5160_s8 + $0x758] sm:$0xff]  ;;  %v286_v60 = vld [vmem:[%s5160_s8 + $0x650] sm:$0xff]  ;;  %v301_v62 = vld [vmem:[%s5160_s8 + $0x6c8] sm:$0xff] }
  0x9f   :  { %2809 = vmatpush3.msra.mxu0 %v290_v43  ;;  %2844 = vmatpush3.msra.mxu1 %v322_v44  ;;  %v318_v61 = vld [vmem:[%s5160_s8 + $0x750] sm:$0xff]  ;;  %v333_v63 = vld [vmem:[%s5160_s8 + $0x7c8] sm:$0xff]  ;;  %v300_v2 = vld [vmem:[%s5160_s8 + $0x6c0] sm:$0xff] }
  0xa0   :  { %2810 = vmatprep.subr.mxu0 %v305_v45  ;;  %2845 = vmatprep.subr.mxu1 %v337_v46  ;;  %v285_v0 = vld [vmem:[%s5160_s8 + $0x648] sm:$0xff]  ;;  %v332_v3 = vld [vmem:[%s5160_s8 + $0x7c0] sm:$0xff]  ;;  %v299_v6 = vld [vmem:[%s5160_s8 + $0x6b8] sm:$0xff] }
  0xa1   :  { %2811 = vmatpush3.msra.mxu0 %v289_v47  ;;  %2846 = vmatpush3.msra.mxu1 %v321_v48  ;;  %v317_v1 = vld [vmem:[%s5160_s8 + $0x748] sm:$0xff]  ;;  %v284_v4 = vld [vmem:[%s5160_s8 + $0x640] sm:$0xff]  ;;  %v331_v7 = vld [vmem:[%s5160_s8 + $0x7b8] sm:$0xff] }
  0xa2   :  { %2812 = vmatprep.subr.mxu0 %v304_v49  ;;  %2847 = vmatprep.subr.mxu1 %v336_v50  ;;  %v316_v5 = vld [vmem:[%s5160_s8 + $0x740] sm:$0xff]  ;;  %v283_v8 = vld [vmem:[%s5160_s8 + $0x638] sm:$0xff]  ;;  %v298_v10 = vld [vmem:[%s5160_s8 + $0x6b0] sm:$0xff] }
  0xa3   :  { %2813 = vmatpush3.msra.mxu0 %v288_v52  ;;  %2848 = vmatpush3.msra.mxu1 %v320_v53  ;;  %v315_v9 = vld [vmem:[%s5160_s8 + $0x738] sm:$0xff]  ;;  %v330_v11 = vld [vmem:[%s5160_s8 + $0x7b0] sm:$0xff]  ;;  %v297_v14 = vld [vmem:[%s5160_s8 + $0x6a8] sm:$0xff] }
  0xa4   :  { %2814 = vmatprep.subr.mxu0 %v303_v54  ;;  %2849 = vmatprep.subr.mxu1 %v335_v55  ;;  %v282_v12 = vld [vmem:[%s5160_s8 + $0x630] sm:$0xff]  ;;  %v329_v15 = vld [vmem:[%s5160_s8 + $0x7a8] sm:$0xff]  ;;  %v82_v18 = vld [vmem:[%s5161_s5 + $0x18] sm:$0xff] }
  0xa5   :  { %2815 = vmatpush3.msra.mxu0 %v287_v56  ;;  %2850 = vmatpush3.msra.mxu1 %v319_v57  ;;  %v314_v13 = vld [vmem:[%s5160_s8 + $0x730] sm:$0xff]  ;;  %v281_v16 = vld [vmem:[%s5160_s8 + $0x628] sm:$0xff]  ;;  %v296_v19 = vld [vmem:[%s5160_s8 + $0x6a0] sm:$0xff]  ;;  %v687_v25 = vcombine.high %v82_v18, %v82_v18  ;;  %v694_v30 = vrot.slane %v82_v18, %v3469_v51 }
  0xa6   :  { %2816 = vmatprep.subr.mxu0 %v302_v58  ;;  %2851 = vmatprep.subr.mxu1 %v334_v59  ;;  %v313_v17 = vld [vmem:[%s5160_s8 + $0x728] sm:$0xff]  ;;  %v328_v20 = vld [vmem:[%s5160_s8 + $0x7a0] sm:$0xff]  ;;  %v295_v23 = vld [vmem:[%s5160_s8 + $0x698] sm:$0xff] }
  0xa7   :  { %2817 = vmatpush3.msra.mxu0 %v286_v60  ;;  %2852 = vmatpush3.msra.mxu1 %v318_v61  ;;  %v280_v21 = vld [vmem:[%s5160_s8 + $0x620] sm:$0xff]  ;;  %v327_v24 = vld [vmem:[%s5160_s8 + $0x798] sm:$0xff]  ;;  %v294_v28 = vld [vmem:[%s5160_s8 + $0x690] sm:$0xff]  ;;  %v701_v35 = vrot.slane %v687_v25, %v3469_v51  ;;  %v702_v40 = vcombine.high %v694_v30, %v694_v30 }
  0xa8   :  { %2818 = vmatprep.subr.mxu0 %v301_v62  ;;  %2853 = vmatprep.subr.mxu1 %v333_v63  ;;  %v312_v22 = vld [vmem:[%s5160_s8 + $0x720] sm:$0xff]  ;;  %v279_v26 = vld [vmem:[%s5160_s8 + $0x618] sm:$0xff]  ;;  %v326_v29 = vld [vmem:[%s5160_s8 + $0x790] sm:$0xff] }
  0xa9   :  { %2819 = vmatpush3.msra.mxu0 %v285_v0  ;;  %2854 = vmatpush3.msra.mxu1 %v317_v1  ;;  %v311_v27 = vld [vmem:[%s5160_s8 + $0x718] sm:$0xff]  ;;  %v278_v31 = vld [vmem:[%s5160_s8 + $0x610] sm:$0xff]  ;;  %v293_v33 = vld [vmem:[%s5160_s8 + $0x688] sm:$0xff]  ;;  %v703_v44 = vcombine.high %v701_v35, %v701_v35 }
  0xaa   :  { %2820 = vmatprep.subr.mxu0 %v300_v2  ;;  %2855 = vmatprep.subr.mxu1 %v332_v3  ;;  %v310_v32 = vld [vmem:[%s5160_s8 + $0x710] sm:$0xff]  ;;  %v325_v34 = vld [vmem:[%s5160_s8 + $0x788] sm:$0xff]  ;;  %v292_v38 = vld [vmem:[%s5160_s8 + $0x680] sm:$0xff] }
  0xab   :  { %2821 = vmatpush3.msra.mxu0 %v284_v4  ;;  %2856 = vmatpush3.msra.mxu1 %v316_v5  ;;  %v277_v36 = vld [vmem:[%s5160_s8 + $0x608] sm:$0xff]  ;;  %v324_v39 = vld [vmem:[%s5160_s8 + $0x780] sm:$0xff]  ;;  %v371_v45 = vld [vmem:[%s5160_s8 + $0x8f8] sm:$0xff] }
  0xac   :  { %2822 = vmatprep.subr.mxu0 %v299_v6  ;;  %2857 = vmatprep.subr.mxu1 %v331_v7  ;;  %v309_v37 = vld [vmem:[%s5160_s8 + $0x708] sm:$0xff]  ;;  %v276_v41 = vld [vmem:[%s5160_s8 + $0x600] sm:$0xff]  ;;  %v403_v46 = vld [vmem:[%s5160_s8 + $0x9f8] sm:$0xff] }
  0xad   :  { %2823 = vmatpush3.msra.mxu0 %v283_v8  ;;  %2858 = vmatpush3.msra.mxu1 %v315_v9  ;;  %v308_v43 = vld [vmem:[%s5160_s8 + $0x700] sm:$0xff]  ;;  %v355_v47 = vld [vmem:[%s5160_s8 + $0x878] sm:$0xff]  ;;  %v370_v49 = vld [vmem:[%s5160_s8 + $0x8f0] sm:$0xff] }
  0xae   :  { %2824 = vmatprep.subr.mxu0 %v298_v10  ;;  %2859 = vmatprep.subr.mxu1 %v330_v11  ;;  %v387_v48 = vld [vmem:[%s5160_s8 + $0x978] sm:$0xff]  ;;  %v402_v50 = vld [vmem:[%s5160_s8 + $0x9f0] sm:$0xff]  ;;  %v369_v54 = vld [vmem:[%s5160_s8 + $0x8e8] sm:$0xff] }
  0xaf   :  { %2825 = vmatpush3.msra.mxu0 %v282_v12  ;;  %2860 = vmatpush3.msra.mxu1 %v314_v13  ;;  %v354_v52 = vld [vmem:[%s5160_s8 + $0x870] sm:$0xff]  ;;  %v401_v55 = vld [vmem:[%s5160_s8 + $0x9e8] sm:$0xff]  ;;  %v368_v58 = vld [vmem:[%s5160_s8 + $0x8e0] sm:$0xff] }
  0xb0   :  { %2826 = vmatprep.subr.mxu0 %v297_v14  ;;  %2861 = vmatprep.subr.mxu1 %v329_v15  ;;  %v386_v53 = vld [vmem:[%s5160_s8 + $0x970] sm:$0xff]  ;;  %v353_v56 = vld [vmem:[%s5160_s8 + $0x868] sm:$0xff]  ;;  %v400_v59 = vld [vmem:[%s5160_s8 + $0x9e0] sm:$0xff] }
  0xb1   :  { %2827 = vmatpush3.msra.mxu0 %v281_v16  ;;  %2862 = vmatpush3.msra.mxu1 %v313_v17  ;;  %v385_v57 = vld [vmem:[%s5160_s8 + $0x968] sm:$0xff]  ;;  %v352_v60 = vld [vmem:[%s5160_s8 + $0x860] sm:$0xff]  ;;  %v367_v62 = vld [vmem:[%s5160_s8 + $0x8d8] sm:$0xff] }
  0xb2   :  { %2828 = vmatprep.subr.mxu0 %v296_v19  ;;  %2863 = vmatprep.subr.mxu1 %v328_v20  ;;  %v384_v61 = vld [vmem:[%s5160_s8 + $0x960] sm:$0xff]  ;;  %v399_v63 = vld [vmem:[%s5160_s8 + $0x9d8] sm:$0xff]  ;;  %v366_v2 = vld [vmem:[%s5160_s8 + $0x8d0] sm:$0xff] }
  0xb3   :  { %2829 = vmatpush3.msra.mxu0 %v280_v21  ;;  %2864 = vmatpush3.msra.mxu1 %v312_v22  ;;  %v351_v0 = vld [vmem:[%s5160_s8 + $0x858] sm:$0xff]  ;;  %v398_v3 = vld [vmem:[%s5160_s8 + $0x9d0] sm:$0xff]  ;;  %v365_v6 = vld [vmem:[%s5160_s8 + $0x8c8] sm:$0xff] }
  0xb4   :  { %2830 = vmatprep.subr.mxu0 %v295_v23  ;;  %2865 = vmatprep.subr.mxu1 %v327_v24  ;;  %v383_v1 = vld [vmem:[%s5160_s8 + $0x958] sm:$0xff]  ;;  %v350_v4 = vld [vmem:[%s5160_s8 + $0x850] sm:$0xff]  ;;  %v397_v7 = vld [vmem:[%s5160_s8 + $0x9c8] sm:$0xff] }
  0xb5   :  { %2831 = vmatpush3.msra.mxu0 %v279_v26  ;;  %2866 = vmatpush3.msra.mxu1 %v311_v27  ;;  %v382_v5 = vld [vmem:[%s5160_s8 + $0x950] sm:$0xff]  ;;  %v349_v8 = vld [vmem:[%s5160_s8 + $0x848] sm:$0xff]  ;;  %v364_v10 = vld [vmem:[%s5160_s8 + $0x8c0] sm:$0xff] }
  0xb6   :  { %2832 = vmatprep.subr.mxu0 %v294_v28  ;;  %2867 = vmatprep.subr.mxu1 %v326_v29  ;;  %v381_v9 = vld [vmem:[%s5160_s8 + $0x948] sm:$0xff]  ;;  %v396_v11 = vld [vmem:[%s5160_s8 + $0x9c0] sm:$0xff]  ;;  %v363_v14 = vld [vmem:[%s5160_s8 + $0x8b8] sm:$0xff] }
  0xb7   :  { %2833 = vmatpush3.msra.mxu0 %v278_v31  ;;  %2868 = vmatpush3.msra.mxu1 %v310_v32  ;;  %v348_v12 = vld [vmem:[%s5160_s8 + $0x840] sm:$0xff]  ;;  %v395_v15 = vld [vmem:[%s5160_s8 + $0x9b8] sm:$0xff]  ;;  %v362_v18 = vld [vmem:[%s5160_s8 + $0x8b0] sm:$0xff] }
  0xb8   :  { %2834 = vmatprep.subr.mxu0 %v293_v33  ;;  %2869 = vmatprep.subr.mxu1 %v325_v34  ;;  %v380_v13 = vld [vmem:[%s5160_s8 + $0x940] sm:$0xff]  ;;  %v347_v16 = vld [vmem:[%s5160_s8 + $0x838] sm:$0xff]  ;;  %v394_v19 = vld [vmem:[%s5160_s8 + $0x9b0] sm:$0xff] }
  0xb9   :  { %2835 = vmatpush3.msra.mxu0 %v277_v36  ;;  %2870 = vmatpush3.msra.mxu1 %v309_v37  ;;  %v379_v17 = vld [vmem:[%s5160_s8 + $0x938] sm:$0xff]  ;;  %v346_v20 = vld [vmem:[%s5160_s8 + $0x830] sm:$0xff]  ;;  %v361_v22 = vld [vmem:[%s5160_s8 + $0x8a8] sm:$0xff] }
  0xba   :  { %2836 = vmatprep.subr.mxu0 %v292_v38  ;;  %2871 = vmatprep.subr.mxu1 %v324_v39  ;;  %v378_v21 = vld [vmem:[%s5160_s8 + $0x930] sm:$0xff]  ;;  %v393_v23 = vld [vmem:[%s5160_s8 + $0x9a8] sm:$0xff]  ;;  %v83_v24 = vld [vmem:[%s5161_s5 + $0x20] sm:$0xff] }
  0xbb   :  { %2837 = vmatpush3.msra.mxu0 %v276_v41  ;;  %1225 = vmatprep.mubr.f32.mxu0 %v702_v40  ;;  %v345_v25 = vld [vmem:[%s5160_s8 + $0x828] sm:$0xff]  ;;  %v360_v27 = vld [vmem:[%s5160_s8 + $0x8a0] sm:$0xff]  ;;  %v704_v31 = vcombine.high %v83_v24, %v83_v24  ;;  %v359_v32 = vld [vmem:[%s5160_s8 + $0x898] sm:$0xff]  ;;  %v711_v38 = vrot.slane %v83_v24, %v3469_v51 }
  0xbc   :  { %2872 = vmatpush3.msra.mxu1 %v308_v43  ;;  %1226 = vmatmul.mubr.f32.vlgmr.msra.gmra.mxu0 %v694_v30  ;;  %v377_v26 = vld [vmem:[%s5160_s8 + $0x928] sm:$0xff]  ;;  %v392_v28 = vld [vmem:[%s5160_s8 + $0x9a0] sm:$0xff]  ;;  %v391_v33 = vld [vmem:[%s5160_s8 + $0x998] sm:$0xff] }
  0xbd   :  { %1295 = vmatprep.mubr.f32.mxu1 %v703_v44  ;;  %2876 = vmatprep.subr.mxu0 %v371_v45  ;;  %v344_v29 = vld [vmem:[%s5160_s8 + $0x820] sm:$0xff]  ;;  %v343_v34 = vld [vmem:[%s5160_s8 + $0x818] sm:$0xff]  ;;  %v358_v36 = vld [vmem:[%s5160_s8 + $0x890] sm:$0xff]  ;;  %v718_v41 = vrot.slane %v704_v31, %v3469_v51 }
  0xbe   :  { %2911 = vmatprep.subr.mxu1 %v403_v46  ;;  %1296 = vmatmul.mubr.f32.vlgmr.msra.gmra.mxu1 %v701_v35  ;;  %v376_v30 = vld [vmem:[%s5160_s8 + $0x920] sm:$0xff]  ;;  %v375_v35 = vld [vmem:[%s5160_s8 + $0x918] sm:$0xff]  ;;  %v390_v37 = vld [vmem:[%s5160_s8 + $0x990] sm:$0xff] }
  0xbf   :  { %2877 = vmatpush3.msra.mxu0 %v355_v47  ;;  %2912 = vmatpush3.msra.mxu1 %v387_v48  ;;  %v342_v39 = vld [vmem:[%s5160_s8 + $0x810] sm:$0xff]  ;;  %v357_v43 = vld [vmem:[%s5160_s8 + $0x888] sm:$0xff]  ;;  %v356_v47 = vld [vmem:[%s5160_s8 + $0x880] sm:$0xff] }
  0xc0   :  { %2878 = vmatprep.subr.mxu0 %v370_v49  ;;  %2913 = vmatprep.subr.mxu1 %v402_v50  ;;  %v374_v40 = vld [vmem:[%s5160_s8 + $0x910] sm:$0xff]  ;;  %v389_v44 = vld [vmem:[%s5160_s8 + $0x988] sm:$0xff]  ;;  %v388_v48 = vld [vmem:[%s5160_s8 + $0x980] sm:$0xff]  ;;  %v719_v49 = vcombine.high %v711_v38, %v711_v38 }
  0xc1   :  { %2879 = vmatpush3.msra.mxu0 %v354_v52  ;;  %2914 = vmatpush3.msra.mxu1 %v386_v53  ;;  %v341_v45 = vld [vmem:[%s5160_s8 + $0x808] sm:$0xff]  ;;  %v340_v50 = vld [vmem:[%s5160_s8 + $0x800] sm:$0xff]  ;;  %v720_v52 = vcombine.high %v718_v41, %v718_v41 }
  0xc2   :  { %2880 = vmatprep.subr.mxu0 %v369_v54  ;;  %2915 = vmatprep.subr.mxu1 %v401_v55  ;;  %v373_v46 = vld [vmem:[%s5160_s8 + $0x908] sm:$0xff]  ;;  %v372_v53 = vld [vmem:[%s5160_s8 + $0x900] sm:$0xff]  ;;  %v3194_v54 = vmov 0.0   ;;  %v1459_v55 = vld [vmem:[%s5162_s6 + $0x18] sm:$0xff] }
  0xc3   :  { %2881 = vmatpush3.msra.mxu0 %v353_v56  ;;  %2916 = vmatpush3.msra.mxu1 %v385_v57  ;;  %v1458_v56 = vld [vmem:[%s5162_s6 + $0x10] sm:$0xff]  ;;  %v1457_v57 = vld [vmem:[%s5162_s6 + $0x8] sm:$0xff] }
  0xc4   :  { %2882 = vmatprep.subr.mxu0 %v368_v58  ;;  %2917 = vmatprep.subr.mxu1 %v400_v59  ;;  %v1456_v58 = vld [vmem:[%s5162_s6] sm:$0xff] }
  0xc5   :  { %2883 = vmatpush3.msra.mxu0 %v352_v60  ;;  %2918 = vmatpush3.msra.mxu1 %v384_v61 }
  0xc6   :  { %2884 = vmatprep.subr.mxu0 %v367_v62  ;;  %2919 = vmatprep.subr.mxu1 %v399_v63 }
  0xc7   :  { %2885 = vmatpush3.msra.mxu0 %v351_v0  ;;  %2920 = vmatpush3.msra.mxu1 %v383_v1 }
  0xc8   :  { %2886 = vmatprep.subr.mxu0 %v366_v2  ;;  %2921 = vmatprep.subr.mxu1 %v398_v3 }
  0xc9   :  { %2887 = vmatpush3.msra.mxu0 %v350_v4  ;;  %2922 = vmatpush3.msra.mxu1 %v382_v5 }
  0xca   :  { %2888 = vmatprep.subr.mxu0 %v365_v6  ;;  %2923 = vmatprep.subr.mxu1 %v397_v7 }
  0xcb   :  { %2889 = vmatpush3.msra.mxu0 %v349_v8  ;;  %2924 = vmatpush3.msra.mxu1 %v381_v9 }
  0xcc   :  { %2890 = vmatprep.subr.mxu0 %v364_v10  ;;  %2925 = vmatprep.subr.mxu1 %v396_v11 }
  0xcd   :  { %2891 = vmatpush3.msra.mxu0 %v348_v12  ;;  %2926 = vmatpush3.msra.mxu1 %v380_v13 }
  0xce   :  { %2892 = vmatprep.subr.mxu0 %v363_v14  ;;  %2927 = vmatprep.subr.mxu1 %v395_v15 }
  0xcf   :  { %2893 = vmatpush3.msra.mxu0 %v347_v16  ;;  %2928 = vmatpush3.msra.mxu1 %v379_v17 }
  0xd0   :  { %2894 = vmatprep.subr.mxu0 %v362_v18  ;;  %2929 = vmatprep.subr.mxu1 %v394_v19 }
  0xd1   :  { %2895 = vmatpush3.msra.mxu0 %v346_v20  ;;  %2930 = vmatpush3.msra.mxu1 %v378_v21 }
  0xd2   :  { %2896 = vmatprep.subr.mxu0 %v361_v22  ;;  %2931 = vmatprep.subr.mxu1 %v393_v23 }
  0xd3   :  { %2897 = vmatpush3.msra.mxu0 %v345_v25  ;;  %2932 = vmatpush3.msra.mxu1 %v377_v26 }
  0xd4   :  { %2898 = vmatprep.subr.mxu0 %v360_v27  ;;  %2933 = vmatprep.subr.mxu1 %v392_v28 }
  0xd5   :  { %2899 = vmatpush3.msra.mxu0 %v344_v29  ;;  %2934 = vmatpush3.msra.mxu1 %v376_v30 }
  0xd6   :  { %2900 = vmatprep.subr.mxu0 %v359_v32  ;;  %2935 = vmatprep.subr.mxu1 %v391_v33 }
  0xd7   :  { %2901 = vmatpush3.msra.mxu0 %v343_v34  ;;  %2936 = vmatpush3.msra.mxu1 %v375_v35 }
  0xd8   :  { %2902 = vmatprep.subr.mxu0 %v358_v36  ;;  %2937 = vmatprep.subr.mxu1 %v390_v37 }
  0xd9   :  { %2903 = vmatpush3.msra.mxu0 %v342_v39  ;;  %2938 = vmatpush3.msra.mxu1 %v374_v40 }
  0xda   :  { %2904 = vmatprep.subr.mxu0 %v357_v43  ;;  %2939 = vmatprep.subr.mxu1 %v389_v44 }
  0xdb   :  { %2905 = vmatpush3.msra.mxu0 %v341_v45  ;;  %2940 = vmatpush3.msra.mxu1 %v373_v46 }
  0xdc   :  { %2906 = vmatprep.subr.mxu0 %v356_v47  ;;  %2941 = vmatprep.subr.mxu1 %v388_v48 }
  0xdd   :  { %2907 = vmatpush3.msra.mxu0 %v340_v50  ;;  %1365 = vmatprep.mubr.f32.mxu0 %v719_v49  ;;  %v1551_v50 = vld [vmem:[%s5164_s4 + $0x18] sm:$0xff] }
  0xde   :  { %2942 = vmatpush3.msra.mxu1 %v372_v53  ;;  %1435 = vmatprep.mubr.f32.mxu1 %v720_v52  ;;  %v1550_v52 = vld [vmem:[%s5164_s4 + $0x10] sm:$0xff]  ;;  %v1549_v53 = vld [vmem:[%s5164_s4 + $0x8] sm:$0xff] }
  0xdf   :  { %1366 = vmatmul.mubr.f32.vlgmr.msra.gmra.mxu0 %v711_v38  ;;  %1436 = vmatmul.mubr.f32.vlgmr.msra.gmra.mxu1 %v718_v41  ;;  %v2507_v41 = vld [vmem:[%s5163_s26] ss:$0 sm:$0xff] }
  0xe0   :  { %3024 = vmatprep.subr.mxu0 %v3194_v54  ;;  %3046 = vmatprep.subr.mxu1 %v3194_v54 }
  0xe1   :  { %3025 = vmatpush3.msra.mxu0 %v1459_v55  ;;  %3032 = vmatprep.mubr.msk.f32.mxu0 %vm3195_vm0, %v3194_v54  ;;  %v1548_v55 = vld [vmem:[%s5164_s4] sm:$0xff] }
  0xe2   :  { %3026 = vmatprep.subr.mxu0 %v3194_v54  ;;  %3078 = vmatprep.mubr.msk.f32.mxu1 %vm3195_vm0, %v3194_v54 }
  0xe3   :  { %3027 = vmatpush3.msra.mxu0 %v1458_v56  ;;  %v1664_v56 = vld [vmem:[%s5127_s10 + $0xf8] sm:$0xff] }
  0xe4   :  { %3028 = vmatprep.subr.mxu0 %v3194_v54 }
  0xe5   :  { %3029 = vmatpush3.msra.mxu0 %v1457_v57  ;;  %v1680_v57 = vld [vmem:[%s5127_s10 + $0x178] sm:$0xff] }
  0xe6   :  { %3030 = vmatprep.subr.mxu0 %v3194_v54  ;;  %3047 = vmatpush3.msra.mxu1 %v1680_v57  ;;  %v2018_v57 = vld [vmem:[%s5133_s16] sm:$0xff] }
  0xe7   :  { %3031 = vmatpush3.msra.mxu0 %v1456_v58  ;;  %3048 = vmatprep.subr.mxu1 %v3194_v54  ;;  %v1679_v58 = vld [vmem:[%s5127_s10 + $0x170] sm:$0xff] }
  0xe8   :  { %3035 = vmatprep.subr.mxu0 %v3194_v54  ;;  %3049 = vmatpush3.msra.mxu1 %v1679_v58  ;;  %v1852_v58 = vld [vmem:[%s5129_s12 + $0x18] sm:$0xff] }
  0xe9   :  { %3050 = vmatprep.subr.mxu1 %v3194_v54 }
  0xf4   :  { %v2558_v59 = vpop.f32.mrf.mxu0 }
  0xf5   :  { %v2593_v60 = vpop.f32.mrf.mxu1 }
  0xf6   :  { %v2559_v61 = vpop.f32.mrf.mxu0 }
  0xf7   :  { %v2594_v63 = vpop.f32.mrf.mxu1  ;;  %v2560_v2 = vadd.f32 %v2559_v61, %v2558_v59  ;;  %v1678_v59 = vld [vmem:[%s5127_s10 + $0x168] sm:$0xff]  ;;  %v1676_v61 = vld [vmem:[%s5127_s10 + $0x158] sm:$0xff] }
  0xf8   :  { %v2595_v3 = vadd.f32 %v2594_v63, %v2593_v60  ;;  %3051 = vmatpush3.msra.mxu1 %v1678_v59  ;;  %v1677_v60 = vld [vmem:[%s5127_s10 + $0x160] sm:$0xff]  ;;  %v1674_v63 = vld [vmem:[%s5127_s10 + $0x148] sm:$0xff] }
  0xf9   :  { %3052 = vmatprep.subr.mxu1 %v3194_v54 }
  0xfa   :  { %v628_v7 = vadd.f32 %v2595_v3, %v2560_v2  ;;  %3053 = vmatpush3.msra.mxu1 %v1677_v60  ;;  %v1671_v2 = vld [vmem:[%s5127_s10 + $0x130] sm:$0xff]  ;;  %v1670_v3 = vld [vmem:[%s5127_s10 + $0x128] sm:$0xff] }
  0xfb   :  { %3054 = vmatprep.subr.mxu1 %v3194_v54  ;;  %v1851_v60 = vld [vmem:[%s5129_s12 + $0x10] sm:$0xff] }
  0xfc   :  { %3055 = vmatpush3.msra.mxu1 %v1676_v61 }
  0xfd   :  { %3056 = vmatprep.subr.mxu1 %v3194_v54 }
 0x116   :  { %v2628_v62 = vpop.f32.mrf.mxu0 }
 0x118   :  { %v2663_v0 = vpop.f32.mrf.mxu1  ;;  %v2629_v1 = vpop.f32.mrf.mxu0 }
 0x119   :  { %v2630_v5 = vadd.f32 %v2629_v1, %v2628_v62  ;;  %v1675_v62 = vld [vmem:[%s5127_s10 + $0x150] sm:$0xff]  ;;  %v1672_v1 = vld [vmem:[%s5127_s10 + $0x138] sm:$0xff] }
 0x11a   :  { %v2664_v6 = vpop.f32.mrf.mxu1  ;;  %3057 = vmatpush3.msra.mxu1 %v1675_v62  ;;  %v1850_v62 = vld [vmem:[%s5129_s12 + $0x8] sm:$0xff] }
 0x11b   :  { %v808_v10 = vadd.f32 %v2630_v5, %v628_v7  ;;  %v2665_v11 = vadd.f32 %v2664_v6, %v2663_v0  ;;  %3058 = vmatprep.subr.mxu1 %v3194_v54  ;;  %v1673_v0 = vld [vmem:[%s5127_s10 + $0x140] sm:$0xff]  ;;  %v1668_v5 = vld [vmem:[%s5127_s10 + $0x118] sm:$0xff]  ;;  %v1667_v7 = vld [vmem:[%s5127_s10 + $0x110] sm:$0xff] }
 0x11c   :  { %3059 = vmatpush3.msra.mxu1 %v1674_v63  ;;  %v1632_v6 = vld [vmem:[%s5165_s2] sm:$0x3f] }
 0x11d   :  { %v878_v15 = vadd.f32 %v2665_v11, %v808_v10  ;;  %3060 = vmatprep.subr.mxu1 %v3194_v54  ;;  %v1665_v10 = vld [vmem:[%s5127_s10 + $0x100] sm:$0xff] }
 0x11e   :  { %3061 = vmatpush3.msra.mxu1 %v1673_v0  ;;  %v1849_v63 = vld [vmem:[%s5129_s12] sm:$0xff] }
 0x11f   :  { %3062 = vmatprep.subr.mxu1 %v3194_v54 }
 0x120   :  { %3063 = vmatpush3.msra.mxu1 %v1672_v1 }
 0x121   :  { %3064 = vmatprep.subr.mxu1 %v3194_v54 }
 0x122   :  { %3065 = vmatpush3.msra.mxu1 %v1671_v2 }
 0x123   :  { %3066 = vmatprep.subr.mxu1 %v3194_v54 }
 0x124   :  { %3067 = vmatpush3.msra.mxu1 %v1670_v3 }
 0x125   :  { %3068 = vmatprep.subr.mxu1 %v3194_v54 }
 0x138   :  { %v2698_v4 = vpop.f32.mrf.mxu0 }
 0x13a   :  { %v2733_v8 = vpop.f32.mrf.mxu1  ;;  %v2699_v9 = vpop.f32.mrf.mxu0 }
 0x13b   :  { %v2700_v13 = vadd.f32 %v2699_v9, %v2698_v4  ;;  %v1669_v4 = vld [vmem:[%s5127_s10 + $0x120] sm:$0xff]  ;;  %v1666_v9 = vld [vmem:[%s5127_s10 + $0x108] sm:$0xff] }
 0x13c   :  { %v2734_v14 = vpop.f32.mrf.mxu1  ;;  %3069 = vmatpush3.msra.mxu1 %v1669_v4 }
 0x13d   :  { %v948_v18 = vadd.f32 %v2700_v13, %v878_v15  ;;  %v2735_v19 = vadd.f32 %v2734_v14, %v2733_v8  ;;  %3070 = vmatprep.subr.mxu1 %v3194_v54  ;;  %v1689_v8 = vcombine.high %v1632_v6, %v1632_v6 }
 0x13e   :  { %3071 = vmatpush3.msra.mxu1 %v1668_v5 }
 0x13f   :  { %v1018_v23 = vadd.f32 %v2735_v19, %v948_v18  ;;  %3072 = vmatprep.subr.mxu1 %v3194_v54  ;;  %v1703_v11 = vrot.slane %v1689_v8, %v3469_v51  ;;  %v4635_v19 = vrot.slane %v1632_v6, %v3469_v51  ;;  %v1647_v51 = vld [vmem:[%s5127_s10 + $0x70] sm:$0xff]  ;;  %v2514_v6 = vld [vmem:[%s5128_s11] ss:$0 sm:$0xff] }
 0x140   :  { %3073 = vmatpush3.msra.mxu1 %v1667_v7 }
 0x141   :  { %3074 = vmatprep.subr.mxu1 %v3194_v54 }
 0x142   :  { %3075 = vmatpush3.msra.mxu1 %v1666_v9 }
 0x143   :  { %3076 = vmatprep.subr.mxu1 %v3194_v54 }
 0x144   :  { %3077 = vmatpush3.msra.mxu1 %v1665_v10 }
 0x145   :  { %3079 = vmatmul.mubr.f32.vlgmr.msra.gmra.mxu1 %v1703_v11  ;;  %3110 = vmatprep.subr.mxu1 %v3194_v54  ;;  %v1937_v11 = vld [vmem:[%s5131_s14 + $0x18] sm:$0xff] }
 0x146   :  { %3114 = vmatprep.mubr.msk.f32.mxu1 %vm3195_vm0, %v3194_v54 }
 0x15a   :  { %v2768_v12 = vpop.f32.mrf.mxu0 }
 0x15c   :  { %v2803_v16 = vpop.f32.mrf.mxu1  ;;  %v2769_v17 = vpop.f32.mrf.mxu0 }
 0x15d   :  { %v2770_v21 = vadd.f32 %v2769_v17, %v2768_v12  ;;  %v2509_v12 = vld [vmem:[%s5166_s28] ss:$0 sm:$0xff]  ;;  %s5167_s28 = sld [smem:[#allocation17_spill]] }
 0x15e   :  { %v2804_v22 = vpop.f32.mrf.mxu1 }
 0x15f   :  { %v1088_v26 = vadd.f32 %v2770_v21, %v1018_v23  ;;  %v2805_v27 = vadd.f32 %v2804_v22, %v2803_v16  ;;  %v1704_v21 = vcombine.high %v4635_v19, %v4635_v19  ;;  %v1648_v23 = vld [vmem:[%s5127_s10 + $0x78] sm:$0xff] }
 0x161   :  { %v1158_v30 = vadd.f32 %v2805_v27, %v1088_v26  ;;  %v1646_v26 = vld [vmem:[%s5127_s10 + $0x68] sm:$0xff]  ;;  %v1661_v27 = vld [vmem:[%s5127_s10 + $0xe0] sm:$0xff] }
 0x163   :  { %v2512_v0 = vld [vmem:[%s5167_s28] ss:$0 sm:$0xff] }
 0x17c   :  { %v2838_v20 = vpop.f32.mrf.mxu0 }
 0x17e   :  { %v2873_v24 = vpop.f32.mrf.mxu1  ;;  %v2839_v25 = vpop.f32.mrf.mxu0 }
 0x17f   :  { %v2840_v28 = vadd.f32 %v2839_v25, %v2838_v20  ;;  %v1662_v25 = vld [vmem:[%s5127_s10 + $0xe8] sm:$0xff] }
 0x180   :  { %v2874_v29 = vpop.f32.mrf.mxu1 }
 0x181   :  { %v1228_v31 = vadd.f32 %v2840_v28, %v1158_v30  ;;  %v2875_v32 = vadd.f32 %v2874_v29, %v2873_v24  ;;  %v1663_v24 = vld [vmem:[%s5127_s10 + $0xf0] sm:$0xff]  ;;  %v1645_v28 = vld [vmem:[%s5127_s10 + $0x60] sm:$0xff]  ;;  %v1660_v29 = vld [vmem:[%s5127_s10 + $0xd8] sm:$0xff] }
 0x182   :  { %v1644_v30 = vld [vmem:[%s5127_s10 + $0x58] sm:$0xff] }
 0x183   :  { %v1298_v37 = vadd.f32 %v2875_v32, %v1228_v31  ;;  %v1659_v31 = vld [vmem:[%s5127_s10 + $0xd0] sm:$0xff] }
 0x184   :  { %v1643_v32 = vld [vmem:[%s5127_s10 + $0x50] sm:$0xff] }
 0x19f   :  { %v2908_v33 = vpop.f32.mrf.mxu0  ;;  %v2943_v34 = vpop.f32.mrf.mxu1 }
 0x1a1   :  { %v2909_v35 = vpop.f32.mrf.mxu0  ;;  %v2944_v36 = vpop.f32.mrf.mxu1 }
 0x1a2   :  { %v2910_v38 = vadd.f32 %v2909_v35, %v2908_v33  ;;  %v2945_v40 = vadd.f32 %v2944_v36, %v2943_v34  ;;  %v1658_v33 = vld [vmem:[%s5127_s10 + $0xc8] sm:$0xff]  ;;  %v1657_v35 = vld [vmem:[%s5127_s10 + $0xc0] sm:$0xff] }
 0x1a3   :  { %v1642_v34 = vld [vmem:[%s5127_s10 + $0x48] sm:$0xff]  ;;  %v1641_v36 = vld [vmem:[%s5127_s10 + $0x40] sm:$0xff] }
 0x1a4   :  { %v1368_v39 = vadd.f32 %v2910_v38, %v1298_v37  ;;  %v1656_v37 = vld [vmem:[%s5127_s10 + $0xb8] sm:$0xff] }
 0x1a5   :  { %v1640_v38 = vld [vmem:[%s5127_s10 + $0x38] sm:$0xff] }
 0x1a6   :  { %v1438_v43 = vadd.f32 %v2945_v40, %v1368_v39  ;;  %v1655_v39 = vld [vmem:[%s5127_s10 + $0xb0] sm:$0xff] }
 0x1a7   :  { %v1639_v40 = vld [vmem:[%s5127_s10 + $0x30] sm:$0xff] }
 0x1a8   :  { %v1448_v44 = vadd.f32 %v2507_v41, %v1438_v43  ;;  %v1654_v41 = vld [vmem:[%s5127_s10 + $0xa8] sm:$0xff] }
 0x1a9   :  { %v1638_v43 = vld [vmem:[%s5127_s10 + $0x28] sm:$0xff] }
 0x1aa   :  { %v2508_v45 = vmul.f32 -1.442695, %v1448_v44 }
 0x1ac   :  { %3129 = vpow2.f32 %v2508_v45  ;;  %v1637_v45 = vld [vmem:[%s5127_s10 + $0x20] sm:$0xff] }
 0x1b9   :  { %v3130_v46 = vpop.eup %3129 }
 0x1ba   :  { %v1452_v47 = vadd.f32 1.0, %v3130_v46  ;;  %v1652_v46 = vld [vmem:[%s5127_s10 + $0x98] sm:$0xff] }
 0x1bc   :  { %3131 = vrcp.f32 %v1452_v47  ;;  %v1636_v47 = vld [vmem:[%s5127_s10 + $0x18] sm:$0xff] }
 0x1c9   :  { %v3132_v48 = vpop.eup %3131 }
 0x1ca   :  { %v1455_v49 = vmul.f32 %v3132_v48, %v1448_v44  ;;  %v1653_v44 = vld [vmem:[%s5127_s10 + $0xa0] sm:$0xff]  ;;  %v1651_v48 = vld [vmem:[%s5127_s10 + $0x90] sm:$0xff] }
 0x1cc   :  { %3033 = vmatmul.mubr.msk.f32.vlgmr.msra.gmra.mxu0 %vm1467_vm1, %v1455_v49  ;;  %v1635_v49 = vld [vmem:[%s5127_s10 + $0x10] sm:$0xff] }
 0x1cd   :  { %3043 = vmatprep.mubr.msk.f32.mxu0 %vm3195_vm0, %v3194_v54  ;;  %3036 = vmatpush3.msra.mxu0 %v1551_v50  ;;  %v1650_v50 = vld [vmem:[%s5127_s10 + $0x88] sm:$0xff] }
 0x1ce   :  { %3037 = vmatprep.subr.mxu0 %v3194_v54 }
 0x1cf   :  { %3038 = vmatpush3.msra.mxu0 %v1550_v52  ;;  %v1634_v52 = vld [vmem:[%s5127_s10 + $0x8] sm:$0xff] }
 0x1d0   :  { %3039 = vmatprep.subr.mxu0 %v3194_v54 }
 0x1d1   :  { %3040 = vmatpush3.msra.mxu0 %v1549_v53  ;;  %v1649_v53 = vld [vmem:[%s5127_s10 + $0x80] sm:$0xff] }
 0x1d2   :  { %3041 = vmatprep.subr.mxu0 %v3194_v54 }
 0x1d3   :  { %3042 = vmatpush3.msra.mxu0 %v1548_v55  ;;  %v1633_v55 = vld [vmem:[%s5127_s10] sm:$0xff] }
 0x1d4   :  { %2956 = vmatprep.subr.mxu0 %v1664_v56  ;;  %v2019_v56 = vld [vmem:[%s5133_s16 + $0x8] sm:$0xff] }
 0x1d5   :  { %3111 = vmatpush3.msra.mxu1 %v2019_v56  ;;  %v2188_v56 = vld [vmem:[%s5136_s19 + $0x20] sm:$0xff] }
 0x1d6   :  { %3112 = vmatprep.subr.mxu1 %v3194_v54 }
 0x1d7   :  { %3113 = vmatpush3.msra.mxu1 %v2018_v57  ;;  %v2187_v57 = vld [vmem:[%s5136_s19 + $0x18] sm:$0xff] }
 0x205   :  { %v1844_v59 = vpop.f32.mrf.mxu1 }
 0x207   :  { %v3080_v61 = vpop.f32.mrf.mxu1 }
 0x208   :  { %v2344_v61 = vld [vmem:[%s5138_s21 + $0xf8] sm:$0xff] }
 0x209   :  { %2389 = vmatprep.subr.mxu1 %v2344_v61  ;;  %v2355_v61 = vld [vmem:[%s5138_s21 + $0x150] sm:$0xff] }
 0x28c   :  { %v1537_v13 = vpop.f32.mrf.mxu0 }
 0x28d   :  { %v1538_v14 = vadd.f32 %v2509_v12, %v1537_v13  ;;  %v1936_v12 = vld [vmem:[%s5131_s14 + $0x10] sm:$0xff]  ;;  %v1935_v13 = vld [vmem:[%s5131_s14 + $0x8] sm:$0xff] }
 0x28e   :  { %v3034_v15 = vpop.f32.mrf.mxu0 }
 0x28f   :  { %v2511_v16 = vmul.f32 -1.442695, %v1538_v14 }
 0x291   :  { %3133 = vpow2.f32 %v2511_v16 }
 0x29e   :  { %v3134_v17 = vpop.eup %3133 }
 0x29f   :  { %v1544_v18 = vadd.f32 1.0, %v3134_v17  ;;  %v2515_v17 = vld [vmem:[%s5130_s13] ss:$0 sm:$0xff] }
 0x2a1   :  { %3135 = vrcp.f32 %v1544_v18 }
 0x2ae   :  { %v3136_v20 = vpop.eup %3135 }
 0x2af   :  { %v1547_v22 = vmul.f32 %v3136_v20, %v1538_v14  ;;  %v1934_v14 = vld [vmem:[%s5131_s14] sm:$0xff] }
 0x2b1   :  { %3044 = vmatmul.mubr.msk.f32.vlgmr.msra.gmra.mxu0 %vm1467_vm1, %v1547_v22  ;;  %v2021_v22 = vld [vmem:[%s5134_s17 + $0x8] sm:$0xff] }
 0x2b2   :  { %2957 = vmatpush3.msra.mxu0 %v1648_v23  ;;  %1772 = vmatprep.mubr.f32.mxu0 %v1704_v21  ;;  %v2020_v23 = vld [vmem:[%s5134_s17] sm:$0xff] }
 0x2b3   :  { %2958 = vmatprep.subr.mxu0 %v1663_v24  ;;  %v2517_v24 = vld [vmem:[%s5132_s15] ss:$0 sm:$0xff] }
 0x2b4   :  { %2959 = vmatpush3.msra.mxu0 %v1647_v51 }
 0x2b5   :  { %2960 = vmatprep.subr.mxu0 %v1662_v25 }
 0x2b6   :  { %2961 = vmatpush3.msra.mxu0 %v1646_v26 }
 0x2b7   :  { %2962 = vmatprep.subr.mxu0 %v1661_v27  ;;  %v2215_v27 = vld [vmem:[%s5136_s19 + $0xf8] sm:$0xff] }
 0x2b8   :  { %2963 = vmatpush3.msra.mxu0 %v1645_v28  ;;  %v2214_v28 = vld [vmem:[%s5136_s19 + $0xf0] sm:$0xff] }
 0x2b9   :  { %2964 = vmatprep.subr.mxu0 %v1660_v29  ;;  %v2213_v29 = vld [vmem:[%s5136_s19 + $0xe8] sm:$0xff] }
 0x2ba   :  { %2965 = vmatpush3.msra.mxu0 %v1644_v30  ;;  %v2212_v30 = vld [vmem:[%s5136_s19 + $0xe0] sm:$0xff] }
 0x2bb   :  { %2966 = vmatprep.subr.mxu0 %v1659_v31  ;;  %v2210_v31 = vld [vmem:[%s5136_s19 + $0xd0] sm:$0xff] }
 0x2bc   :  { %2967 = vmatpush3.msra.mxu0 %v1643_v32  ;;  %v2209_v32 = vld [vmem:[%s5136_s19 + $0xc8] sm:$0xff] }
 0x2bd   :  { %2968 = vmatprep.subr.mxu0 %v1658_v33  ;;  %v2208_v33 = vld [vmem:[%s5136_s19 + $0xc0] sm:$0xff] }
 0x2be   :  { %2969 = vmatpush3.msra.mxu0 %v1642_v34  ;;  %v2207_v34 = vld [vmem:[%s5136_s19 + $0xb8] sm:$0xff] }
 0x2bf   :  { %2970 = vmatprep.subr.mxu0 %v1657_v35  ;;  %v2206_v35 = vld [vmem:[%s5136_s19 + $0xb0] sm:$0xff] }
 0x2c0   :  { %2971 = vmatpush3.msra.mxu0 %v1641_v36  ;;  %v2205_v36 = vld [vmem:[%s5136_s19 + $0xa8] sm:$0xff] }
 0x2c1   :  { %2972 = vmatprep.subr.mxu0 %v1656_v37  ;;  %v2204_v37 = vld [vmem:[%s5136_s19 + $0xa0] sm:$0xff] }
 0x2c2   :  { %2973 = vmatpush3.msra.mxu0 %v1640_v38  ;;  %v2203_v38 = vld [vmem:[%s5136_s19 + $0x98] sm:$0xff] }
 0x2c3   :  { %2974 = vmatprep.subr.mxu0 %v1655_v39  ;;  %v2202_v39 = vld [vmem:[%s5136_s19 + $0x90] sm:$0xff] }
 0x2c4   :  { %2975 = vmatpush3.msra.mxu0 %v1639_v40  ;;  %v2201_v40 = vld [vmem:[%s5136_s19 + $0x88] sm:$0xff] }
 0x2c5   :  { %2976 = vmatprep.subr.mxu0 %v1654_v41  ;;  %v2200_v41 = vld [vmem:[%s5136_s19 + $0x80] sm:$0xff] }
 0x2c6   :  { %2977 = vmatpush3.msra.mxu0 %v1638_v43  ;;  %v2199_v43 = vld [vmem:[%s5136_s19 + $0x78] sm:$0xff] }
 0x2c7   :  { %2978 = vmatprep.subr.mxu0 %v1653_v44  ;;  %v2198_v44 = vld [vmem:[%s5136_s19 + $0x70] sm:$0xff] }
 0x2c8   :  { %2979 = vmatpush3.msra.mxu0 %v1637_v45  ;;  %v2197_v45 = vld [vmem:[%s5136_s19 + $0x68] sm:$0xff] }
 0x2c9   :  { %2980 = vmatprep.subr.mxu0 %v1652_v46  ;;  %v2196_v46 = vld [vmem:[%s5136_s19 + $0x60] sm:$0xff] }
 0x2ca   :  { %2981 = vmatpush3.msra.mxu0 %v1636_v47  ;;  %v2195_v47 = vld [vmem:[%s5136_s19 + $0x58] sm:$0xff] }
 0x2cb   :  { %2982 = vmatprep.subr.mxu0 %v1651_v48  ;;  %v2194_v48 = vld [vmem:[%s5136_s19 + $0x50] sm:$0xff] }
 0x2cc   :  { %2983 = vmatpush3.msra.mxu0 %v1635_v49  ;;  %v2193_v49 = vld [vmem:[%s5136_s19 + $0x48] sm:$0xff] }
 0x2cd   :  { %2984 = vmatprep.subr.mxu0 %v1650_v50  ;;  %v2192_v50 = vld [vmem:[%s5136_s19 + $0x40] sm:$0xff] }
 0x2ce   :  { %2985 = vmatpush3.msra.mxu0 %v1634_v52  ;;  %v2191_v52 = vld [vmem:[%s5136_s19 + $0x38] sm:$0xff] }
 0x2cf   :  { %2986 = vmatprep.subr.mxu0 %v1649_v53  ;;  %v2190_v53 = vld [vmem:[%s5136_s19 + $0x30] sm:$0xff] }
 0x2d0   :  { %2987 = vmatpush3.msra.mxu0 %v1633_v55  ;;  %v2189_v55 = vld [vmem:[%s5136_s19 + $0x28] sm:$0xff] }
 0x2d1   :  { %1773 = vmatmul.mubr.f32.vlgmr.msra.gmra.mxu0 %v4635_v19  ;;  %3081 = vmatprep.subr.mxu0 %v3194_v54 }
 0x2d2   :  { %3089 = vmatprep.mubr.msk.f32.mxu0 %vm3195_vm0, %v3194_v54  ;;  %3082 = vmatpush3.msra.mxu0 %v1852_v58  ;;  %v2186_v58 = vld [vmem:[%s5136_s19 + $0x10] sm:$0xff] }
 0x2d3   :  { %3083 = vmatprep.subr.mxu0 %v3194_v54 }
 0x2d4   :  { %3084 = vmatpush3.msra.mxu0 %v1851_v60  ;;  %v2184_v60 = vld [vmem:[%s5136_s19] sm:$0xff] }
 0x2d5   :  { %3085 = vmatprep.subr.mxu0 %v3194_v54 }
 0x2d6   :  { %3086 = vmatpush3.msra.mxu0 %v1850_v62  ;;  %v2343_v62 = vld [vmem:[%s5138_s21 + $0xf0] sm:$0xff] }
 0x2d7   :  { %3087 = vmatprep.subr.mxu0 %v3194_v54 }
 0x2d8   :  { %3088 = vmatpush3.msra.mxu0 %v1849_v63  ;;  %v2342_v63 = vld [vmem:[%s5138_s21 + $0xe8] sm:$0xff] }
 0x2d9   :  { %3092 = vmatprep.subr.mxu0 %v3194_v54 }
 0x371   :  { %v1628_v1 = vpop.f32.mrf.mxu0 }
 0x372   :  { %v1629_v2 = vadd.f32 %v2512_v0, %v1628_v1  ;;  %v2341_v0 = vld [vmem:[%s5138_s21 + $0xe0] sm:$0xff]  ;;  %v2340_v1 = vld [vmem:[%s5138_s21 + $0xd8] sm:$0xff] }
 0x373   :  { %v3045_v3 = vpop.f32.mrf.mxu0 }
 0x374   :  { %3115 = vmatmul.mubr.msk.f32.vlgmr.msra.gmra.mxu1 %vm2022_vm2, %v1629_v2  ;;  %2473 = vst.msk [vmem:[#allocation2] sm:$0x3] %vm2472_vm3, %v1629_v2  ;;  %v2339_v2 = vld [vmem:[%s5138_s21 + $0xd0] sm:$0xff]  ;;  %v2338_v3 = vld [vmem:[%s5138_s21 + $0xc8] sm:$0xff] }
 0x375   :  { %2390 = vmatpush1.msra.mxu1 %v2343_v62  ;;  %v2354_v62 = vld [vmem:[%s5138_s21 + $0x148] sm:$0xff] }
 0x376   :  { %2391 = vmatprep.subr.mxu1 %v2342_v63  ;;  %v2353_v63 = vld [vmem:[%s5138_s21 + $0x140] sm:$0xff] }
 0x377   :  { %2392 = vmatpush1.msra.mxu1 %v2341_v0  ;;  %v2352_v0 = vld [vmem:[%s5138_s21 + $0x138] sm:$0xff] }
 0x378   :  { %2393 = vmatprep.subr.mxu1 %v2340_v1  ;;  %v2351_v1 = vld [vmem:[%s5138_s21 + $0x130] sm:$0xff] }
 0x379   :  { %2394 = vmatpush1.msra.mxu1 %v2339_v2  ;;  %v2350_v2 = vld [vmem:[%s5138_s21 + $0x128] sm:$0xff] }
 0x37a   :  { %2395 = vmatprep.subr.mxu1 %v2338_v3  ;;  %v2349_v3 = vld [vmem:[%s5138_s21 + $0x120] sm:$0xff] }
 0x391   :  { %v2988_v4 = vpop.f32.mrf.mxu0 }
 0x393   :  { %v2989_v5 = vpop.f32.mrf.mxu0 }
 0x394   :  { %v2990_v7 = vadd.f32 %v2989_v5, %v2988_v4  ;;  %v2337_v4 = vld [vmem:[%s5138_s21 + $0xc0] sm:$0xff]  ;;  %v2336_v5 = vld [vmem:[%s5138_s21 + $0xb8] sm:$0xff] }
 0x395   :  { %2396 = vmatpush1.msra.mxu1 %v2337_v4  ;;  %v2348_v4 = vld [vmem:[%s5138_s21 + $0x118] sm:$0xff] }
 0x396   :  { %v1775_v8 = vadd.f32 %v2990_v7, %v2514_v6  ;;  %v2335_v6 = vld [vmem:[%s5138_s21 + $0xb0] sm:$0xff]  ;;  %v2334_v7 = vld [vmem:[%s5138_s21 + $0xa8] sm:$0xff]  ;;  %2397 = vmatprep.subr.mxu1 %v2336_v5 }
 0x397   :  { %2398 = vmatpush1.msra.mxu1 %v2335_v6  ;;  %v2347_v5 = vld [vmem:[%s5138_s21 + $0x110] sm:$0xff]  ;;  %v2346_v6 = vld [vmem:[%s5138_s21 + $0x108] sm:$0xff] }
 0x398   :  { %v1845_v9 = vadd.f32 %v1844_v59, %v1775_v8  ;;  %v2185_v59 = vld [vmem:[%s5136_s19 + $0x8] sm:$0xff]  ;;  %v2333_v8 = vld [vmem:[%s5138_s21 + $0xa0] sm:$0xff]  ;;  %2399 = vmatprep.subr.mxu1 %v2334_v7 }
 0x399   :  { %2400 = vmatpush1.msra.mxu1 %v2333_v8  ;;  %v2345_v7 = vld [vmem:[%s5138_s21 + $0x100] sm:$0xff]  ;;  %v2220_v8 = vsub.s32 0, %v3442_v42 }
 0x39a   :  { %v1848_v10 = vmax.f32 %v1845_v9, 0.0  ;;  %v2332_v9 = vld [vmem:[%s5138_s21 + $0x98] sm:$0xff] }
 0x39b   :  { %2401 = vmatprep.subr.mxu1 %v2332_v9  ;;  %v2216_v9 = vld [vmem:[%s5137_s20] sm:$0x3]  ;;  %s3196_s20 = smov [#allocation2]  }
 0x39c   :  { %3090 = vmatmul.mubr.msk.f32.vlgmr.msra.gmra.mxu0 %vm1467_vm1, %v1848_v10  ;;  %v2331_v10 = vld [vmem:[%s5138_s21 + $0x90] sm:$0xff] }
 0x39d   :  { %3100 = vmatprep.mubr.msk.f32.mxu0 %vm3195_vm0, %v3194_v54  ;;  %3093 = vmatpush3.msra.mxu0 %v1937_v11  ;;  %v2330_v11 = vld [vmem:[%s5138_s21 + $0x88] sm:$0xff] }
 0x39e   :  { %3094 = vmatprep.subr.mxu0 %v3194_v54  ;;  %2402 = vmatpush1.msra.mxu1 %v2331_v10  ;;  %v2224_v10 = vsub.s32 1, %v3442_v42 }
 0x39f   :  { %3095 = vmatpush3.msra.mxu0 %v1936_v12  ;;  %v2329_v12 = vld [vmem:[%s5138_s21 + $0x80] sm:$0xff]  ;;  %2403 = vmatprep.subr.mxu1 %v2330_v11  ;;  %v2221_v11 = vrot.slane %v2216_v9, %v2220_v8 }
 0x3a0   :  { %3096 = vmatprep.subr.mxu0 %v3194_v54  ;;  %2404 = vmatpush1.msra.mxu1 %v2329_v12  ;;  %v2225_v12 = vrot.slane %v2216_v9, %v2224_v10 }
 0x3a1   :  { %3097 = vmatpush3.msra.mxu0 %v1935_v13  ;;  %v2328_v13 = vld [vmem:[%s5138_s21 + $0x78] sm:$0xff] }
 0x3a2   :  { %3098 = vmatprep.subr.mxu0 %v3194_v54  ;;  %2405 = vmatprep.subr.mxu1 %v2328_v13 }
 0x3a3   :  { %3099 = vmatpush3.msra.mxu0 %v1934_v14  ;;  %v2327_v14 = vld [vmem:[%s5138_s21 + $0x70] sm:$0xff] }
 0x3a4   :  { %3103 = vmatprep.subr.mxu0 %v3194_v54  ;;  %2406 = vmatpush1.msra.mxu1 %v2327_v14 }
 0x434   :  { %v4787_v15 = vpop.f32.mrf.mxu1 }
 0x436   :  { %v3116_v16 = vpop.f32.mrf.mxu1 }
 0x437   :  { %v2326_v16 = vld [vmem:[%s5138_s21 + $0x68] sm:$0xff] }
 0x438   :  { %2407 = vmatprep.subr.mxu1 %v2326_v16 }
 0x45c   :  { %v1929_v18 = vpop.f32.mrf.mxu0 }
 0x45d   :  { %v1930_v19 = vadd.f32 %v2515_v17, %v1929_v18  ;;  %v2325_v17 = vld [vmem:[%s5138_s21 + $0x60] sm:$0xff]  ;;  %v2324_v18 = vld [vmem:[%s5138_s21 + $0x58] sm:$0xff] }
 0x45e   :  { %v3091_v20 = vpop.f32.mrf.mxu0  ;;  %2408 = vmatpush1.msra.mxu1 %v2325_v17 }
 0x45f   :  { %v1933_v21 = vmax.f32 %v1930_v19, 0.0  ;;  %v2323_v19 = vld [vmem:[%s5138_s21 + $0x50] sm:$0xff]  ;;  %v2322_v20 = vld [vmem:[%s5138_s21 + $0x48] sm:$0xff]  ;;  %2409 = vmatprep.subr.mxu1 %v2324_v18 }
 0x460   :  { %2410 = vmatpush1.msra.mxu1 %v2323_v19 }
 0x461   :  { %3101 = vmatmul.mubr.msk.f32.vlgmr.msra.gmra.mxu0 %vm1467_vm1, %v1933_v21  ;;  %v2321_v21 = vld [vmem:[%s5138_s21 + $0x40] sm:$0xff]  ;;  %2411 = vmatprep.subr.mxu1 %v2322_v20 }
 0x462   :  { %3104 = vmatpush3.msra.mxu0 %v2021_v22  ;;  %3107 = vmatprep.mubr.msk.f32.mxu0 %vm3195_vm0, %v3194_v54 }
 0x463   :  { %3105 = vmatprep.subr.mxu0 %v3194_v54  ;;  %2412 = vmatpush1.msra.mxu1 %v2321_v21 }
 0x464   :  { %3106 = vmatpush3.msra.mxu0 %v2020_v23  ;;  %v2521_v23 = vld [vmem:[%s5135_s18] ss:$0 sm:$0xff] }
 0x465   :  { %2228 = vmatprep.subr.mxu0 %v2215_v27 }
 0x521   :  { %v2014_v51 = vpop.f32.mrf.mxu0 }
 0x522   :  { %v2015_v25 = vadd.f32 %v2517_v24, %v2014_v51 }
 0x523   :  { %v3102_v26 = vpop.f32.mrf.mxu0 }
 0x524   :  { %3108 = vmatmul.mubr.msk.f32.vlgmr.msra.gmra.mxu0 %vm2022_vm2, %v2015_v25  ;;  %2474 = vst.msk [vmem:[#allocation4] sm:$0x3] %vm2472_vm3, %v2015_v25 }
 0x525   :  { %2292 = vmatprep.mubr.f32.mxu0 %v3194_v54  ;;  %2229 = vmatpush1.msra.mxu0 %v2214_v28  ;;  %v2211_v54 = vld [vmem:[%s5136_s19 + $0xd8] sm:$0xff]  ;;  %s3197_s19 = smov [#allocation4]  }
 0x526   :  { %2230 = vmatprep.subr.mxu0 %v2213_v29  ;;  %s2493_s28 = sshll.u32 %s3197_s19, 4  ;;  %s2494_s28 = int_to_ptr.vmem [resolvable:$true] %s2493_s28 }
 0x527   :  { %2231 = vmatpush1.msra.mxu0 %v2212_v30 }
 0x528   :  { %2232 = vmatprep.subr.mxu0 %v2211_v54  ;;  %v2320_v54 = vld [vmem:[%s5138_s21 + $0x38] sm:$0xff] }
 0x529   :  { %2233 = vmatpush1.msra.mxu0 %v2210_v31  ;;  %2413 = vmatprep.subr.mxu1 %v2320_v54  ;;  %v2319_v31 = vld [vmem:[%s5138_s21 + $0x30] sm:$0xff] }
 0x52a   :  { %2234 = vmatprep.subr.mxu0 %v2209_v32  ;;  %2414 = vmatpush1.msra.mxu1 %v2319_v31  ;;  %v2317_v32 = vld [vmem:[%s5138_s21 + $0x20] sm:$0xff] }
 0x52b   :  { %2235 = vmatpush1.msra.mxu0 %v2208_v33  ;;  %v2316_v33 = vld [vmem:[%s5138_s21 + $0x18] sm:$0xff] }
 0x52c   :  { %2236 = vmatprep.subr.mxu0 %v2207_v34  ;;  %v2315_v34 = vld [vmem:[%s5138_s21 + $0x10] sm:$0xff] }
 0x52d   :  { %2237 = vmatpush1.msra.mxu0 %v2206_v35  ;;  %v2314_v35 = vld [vmem:[%s5138_s21 + $0x8] sm:$0xff] }
 0x52e   :  { %2238 = vmatprep.subr.mxu0 %v2205_v36  ;;  %v2313_v36 = vld [vmem:[%s5138_s21] sm:$0xff] }
 0x52f   :  { %2239 = vmatpush1.msra.mxu0 %v2204_v37  ;;  %v2376_v37 = vld [vmem:[%s5138_s21 + $0x1f8] sm:$0xff] }
 0x530   :  { %2240 = vmatprep.subr.mxu0 %v2203_v38  ;;  %v2375_v38 = vld [vmem:[%s5138_s21 + $0x1f0] sm:$0xff] }
 0x531   :  { %2241 = vmatpush1.msra.mxu0 %v2202_v39  ;;  %v2374_v39 = vld [vmem:[%s5138_s21 + $0x1e8] sm:$0xff] }
 0x532   :  { %2242 = vmatprep.subr.mxu0 %v2201_v40  ;;  %v2373_v40 = vld [vmem:[%s5138_s21 + $0x1e0] sm:$0xff] }
 0x533   :  { %2243 = vmatpush1.msra.mxu0 %v2200_v41  ;;  %v2372_v41 = vld [vmem:[%s5138_s21 + $0x1d8] sm:$0xff] }
 0x534   :  { %2244 = vmatprep.subr.mxu0 %v2199_v43  ;;  %v2371_v43 = vld [vmem:[%s5138_s21 + $0x1d0] sm:$0xff] }
 0x535   :  { %2245 = vmatpush1.msra.mxu0 %v2198_v44  ;;  %v2370_v44 = vld [vmem:[%s5138_s21 + $0x1c8] sm:$0xff] }
 0x536   :  { %2246 = vmatprep.subr.mxu0 %v2197_v45  ;;  %v2369_v45 = vld [vmem:[%s5138_s21 + $0x1c0] sm:$0xff] }
 0x537   :  { %2247 = vmatpush1.msra.mxu0 %v2196_v46  ;;  %v2368_v46 = vld [vmem:[%s5138_s21 + $0x1b8] sm:$0xff] }
 0x538   :  { %2248 = vmatprep.subr.mxu0 %v2195_v47  ;;  %v2367_v47 = vld [vmem:[%s5138_s21 + $0x1b0] sm:$0xff] }
 0x539   :  { %2249 = vmatpush1.msra.mxu0 %v2194_v48  ;;  %v2366_v48 = vld [vmem:[%s5138_s21 + $0x1a8] sm:$0xff] }
 0x53a   :  { %2250 = vmatprep.subr.mxu0 %v2193_v49  ;;  %v2365_v49 = vld [vmem:[%s5138_s21 + $0x1a0] sm:$0xff] }
 0x53b   :  { %2251 = vmatpush1.msra.mxu0 %v2192_v50  ;;  %v2364_v50 = vld [vmem:[%s5138_s21 + $0x198] sm:$0xff] }
 0x53c   :  { %2252 = vmatprep.subr.mxu0 %v2191_v52  ;;  %v2363_v52 = vld [vmem:[%s5138_s21 + $0x190] sm:$0xff] }
 0x53d   :  { %2253 = vmatpush1.msra.mxu0 %v2190_v53  ;;  %v2362_v53 = vld [vmem:[%s5138_s21 + $0x188] sm:$0xff] }
 0x53e   :  { %2254 = vmatprep.subr.mxu0 %v2189_v55  ;;  %v2361_v55 = vld [vmem:[%s5138_s21 + $0x180] sm:$0xff] }
 0x53f   :  { %2255 = vmatpush1.msra.mxu0 %v2188_v56  ;;  %v2360_v56 = vld [vmem:[%s5138_s21 + $0x178] sm:$0xff] }
 0x540   :  { %2256 = vmatprep.subr.mxu0 %v2187_v57  ;;  %v2359_v57 = vld [vmem:[%s5138_s21 + $0x170] sm:$0xff] }
 0x541   :  { %2257 = vmatpush1.msra.mxu0 %v2186_v58  ;;  %v2358_v58 = vld [vmem:[%s5138_s21 + $0x168] sm:$0xff] }
 0x542   :  { %2258 = vmatprep.subr.mxu0 %v2185_v59  ;;  %v2357_v59 = vld [vmem:[%s5138_s21 + $0x160] sm:$0xff] }
 0x543   :  { %2259 = vmatpush1.msra.mxu0 %v2184_v60  ;;  %v2356_v60 = vld [vmem:[%s5138_s21 + $0x158] sm:$0xff] }
 0x5e4   :  { %v2092_v22 = vpop.f32.mrf.mxu0 }
 0x5e5   :  { %v2166_v24 = vadd.f32 %v4787_v15, %v2092_v22  ;;  %v2318_v15 = vld [vmem:[%s5138_s21 + $0x28] sm:$0xff]  ;;  %s2483_s21 = sshll.u32 %s3196_s20, 4  ;;  %s2484_s21 = int_to_ptr.vmem [resolvable:$true] %s2483_s21 }
 0x5e6   :  { %v3109_v51 = vpop.f32.mrf.mxu0  ;;  %2415 = vmatprep.subr.mxu1 %v2318_v15  ;;  %s3149_s15 = scalar_lea.vmem %s2484_s21, 32  ;;  %p3154_p1 = scmp.lt.s32.totalorder %s2484_s21, %s2484_s21 }
 0x5e7   :  { %v2176_v25 = vadd.f32 %v2521_v23, %v2166_v24  ;;  %2416 = vmatpush1.msra.mxu1 %v2317_v32  ;;  %p3150_p0 = scmp.ne.s32.totalorder %s2484_s21, %s3149_s15  ;;  %p3155_p2 = scmp.lt.s32.totalorder %s3149_s15, %s3149_s15 }
 0x5e8   :  { %2417 = vmatprep.subr.mxu1 %v2316_v33 }
 0x5e9   :  { %v2522_v26 = vmul.f32 -1.442695, %v2176_v25  ;;  %2418 = vmatpush1.msra.mxu1 %v2315_v34  ;;  %p3156_p3 = por %p3155_p2, %p3154_p1 }
 0x5ea   :  { %2419 = vmatprep.subr.mxu1 %v2314_v35 }
 0x5eb   :  { %3137 = vpow2.f32 %v2522_v26  ;;  %2420 = vmatpush1.msra.mxu1 %v2313_v36  ;;  %p3157_p4 = pnand %p3156_p3, %p3150_p0 }
 0x5ec   :  { %2421 = vmatprep.subr.mxu1 %v2376_v37 }
 0x5ed   :  { %2422 = vmatpush2.msra.mxu1 %v2375_v38 }
 0x5ee   :  { %2423 = vmatprep.subr.mxu1 %v2374_v39 }
 0x5ef   :  { %2424 = vmatpush2.msra.mxu1 %v2373_v40 }
 0x5f0   :  { %2425 = vmatprep.subr.mxu1 %v2372_v41 }
 0x5f1   :  { %2426 = vmatpush2.msra.mxu1 %v2371_v43 }
 0x5f2   :  { %2427 = vmatprep.subr.mxu1 %v2370_v44 }
 0x5f3   :  { %2428 = vmatpush2.msra.mxu1 %v2369_v45 }
 0x5f4   :  { %2429 = vmatprep.subr.mxu1 %v2368_v46 }
 0x5f5   :  { %2430 = vmatpush2.msra.mxu1 %v2367_v47 }
 0x5f6   :  { %2431 = vmatprep.subr.mxu1 %v2366_v48 }
 0x5f7   :  { %2432 = vmatpush2.msra.mxu1 %v2365_v49 }
 0x5f8   :  { %v3138_v27 = vpop.eup %3137  ;;  %2433 = vmatprep.subr.mxu1 %v2364_v50 }
 0x5f9   :  { %v2180_v28 = vadd.f32 1.0, %v3138_v27  ;;  %2434 = vmatpush2.msra.mxu1 %v2363_v52 }
 0x5fa   :  { %2435 = vmatprep.subr.mxu1 %v2362_v53 }
 0x5fb   :  { %3139 = vrcp.f32 %v2180_v28  ;;  %2436 = vmatpush2.msra.mxu1 %v2361_v55 }
 0x5fc   :  { %2437 = vmatprep.subr.mxu1 %v2360_v56 }
 0x5fd   :  { %2438 = vmatpush2.msra.mxu1 %v2359_v57 }
 0x5fe   :  { %2439 = vmatprep.subr.mxu1 %v2358_v58 }
 0x5ff   :  { %2440 = vmatpush2.msra.mxu1 %v2357_v59 }
 0x600   :  { %2441 = vmatprep.subr.mxu1 %v2356_v60 }
 0x601   :  { %2442 = vmatpush2.msra.mxu1 %v2355_v61 }
 0x602   :  { %2443 = vmatprep.subr.mxu1 %v2354_v62 }
 0x603   :  { %2444 = vmatpush2.msra.mxu1 %v2353_v63 }
 0x604   :  { %2445 = vmatprep.subr.mxu1 %v2352_v0 }
 0x605   :  { %2446 = vmatpush2.msra.mxu1 %v2351_v1 }
 0x606   :  { %2447 = vmatprep.subr.mxu1 %v2350_v2 }
 0x607   :  { %2448 = vmatpush2.msra.mxu1 %v2349_v3 }
 0x608   :  { %v3140_v29 = vpop.eup %3139  ;;  %2449 = vmatprep.subr.mxu1 %v2348_v4 }
 0x609   :  { %v2183_v30 = vmul.f32 %v3140_v29, %v2176_v25  ;;  %2450 = vmatpush2.msra.mxu1 %v2347_v5 }
 0x60a   :  { %2451 = vmatprep.subr.mxu1 %v2346_v6 }
 0x60b   :  { %2293 = vmatmul.mubr.f32.vlgmr.msra.gmra.mxu0 %v2183_v30  ;;  %2452 = vmatpush2.msra.mxu1 %v2345_v7 }
 0x6cb   :  { %v2294_v13 = vpop.f32.mrf.mxu0 }
 0x6cc   :  { %v2295_v14 = vadd.f32 %v2294_v13, %v2221_v11 }
 0x6cd   :  { %v2296_v16 = vpop.f32.mrf.mxu0 }
 0x6ce   :  { %v2523_v17 = vmul.f32 -1.442695, %v2295_v14  ;;  %v2297_v18 = vadd.f32 %v2296_v16, %v2225_v12 }
 0x6d0   :  { %3141 = vpow2.f32 %v2523_v17  ;;  %v2524_v19 = vmul.f32 -1.442695, %v2297_v18 }
 0x6d2   :  { %3143 = vpow2.f32 %v2524_v19 }
 0x6dd   :  { %v3142_v20 = vpop.eup %3141 }
 0x6de   :  { %v2305_v21 = vadd.f32 1.0, %v3142_v20 }
 0x6df   :  { %v3144_v22 = vpop.eup %3143 }
 0x6e0   :  { %v2306_v23 = vadd.f32 1.0, %v3144_v22  ;;  %3145 = vrcp.f32 %v2305_v21 }
 0x6e2   :  { %3147 = vrcp.f32 %v2306_v23 }
 0x6ed   :  { %v3146_v24 = vpop.eup %3145 }
 0x6ee   :  { %v2311_v42 = vmul.f32 %v3146_v24, %v2295_v14 }
 0x6ef   :  { %v3148_v51 = vpop.eup %3147 }
 0x6f0   :  { %v2312_v25 = vmul.f32 %v3148_v51, %v2297_v18 }
 0x6f2   :  { %2453 = vmatprep.mubr.f32.mxu1 %v2312_v25 }
 0x6f3   :  { %2454 = vmatmul.mubr.f32.vlgmr.msra.gmra.mxu1 %v2311_v42 }
 0x6f4   :  { %3160 = shalt.err (!%p3157_p4)
}
 0x6f5   :  { %2486 = dma.vmem_to_hbm [thread:$0]  %s2484_s21, 32, %s5141_s24, [#allocation3]  }
 0x6f6   :  { %s3169_s6 = scalar_lea.vmem %s2494_s28, 32  ;;  %p3174_p6 = scmp.lt.s32.totalorder %s2494_s28, %s2494_s28 }
 0x6f7   :  { %p3170_p5 = scmp.ne.s32.totalorder %s2494_s28, %s3169_s6  ;;  %p3175_p7 = scmp.lt.s32.totalorder %s3169_s6, %s3169_s6 }
 0x6f9   :  { %p3176_p8 = por %p3175_p7, %p3174_p6 }
 0x6fb   :  { %p3177_p9 = pnand %p3176_p8, %p3170_p5 }
 0x6fd   :  { %3180 = shalt.err (!%p3177_p9)
}
 0x6fe   :  { %2496 = dma.vmem_to_hbm [thread:$0]  %s2494_s28, 32, %s5142_s25, [#allocation5]   ;;  %v2377_v26 = vld [vmem:[%s5139_s22] sm:$0x3] }
 0x6ff   :  { %v2382_v27 = vrot.slane %v2377_v26, %v2220_v8  ;;  %v2386_v28 = vrot.slane %v2377_v26, %v2224_v10 }
 0x7b3   :  { %v2455_v29 = vpop.f32.mrf.mxu1 }
 0x7b4   :  { %v2456_v54 = vadd.f32 %v2455_v29, %v2382_v27 }
 0x7b5   :  { %v2457_v30 = vpop.f32.mrf.mxu1 }
 0x7b6   :  { %v2458_v31 = vadd.f32 %v2457_v30, %v2386_v28 }
 0x7b8   :  { %v2462_v15 = vcombine.low %v2456_v54, %v2458_v31 }
 0x7ba   :  { %2525 = vst.sshfl [vmem:[%s5140_s23] sm:$0x33 pattern:$0x76325410] %v2462_v15 }
 0x7bb   :  { %3189 = dma.done.wait [#allocation3], 32  }
 0x7bc   :  { %3190 = vsyncadd [#allocation3], 4294967264 }
 0x7bd   :  { %3191 = dma.done.wait [#allocation5], 32  }
 0x7be   :  { %3192 = vsyncadd [#allocation5], 4294967264 }
 0x7bf   :  { %2505 = vsyncpa [#allocation3], 1 }
 0x7c0   :  { %2506 = vsyncpa [#allocation5], 1 }

</bundles_post_ra>
